<compile_context>
chip_gen: v5e
topology: v5e:2x2
jax: 0.10.0
libtpu: 0.0.40
codegen_flags: <defaults>
</compile_context>

<pallas_src>
import functools

import jax
import jax.numpy as jnp
from jax.experimental import pallas as pl
from jax.experimental.pallas import tpu as pltpu


def _round_up(a: int, b: int) -> int:
    return ((a + b - 1) // b) * b


def _rnn_chunk_kernel(pre_ref, whhT_ref, out_ref, h_scr):
    # Grid: (batch_tile [parallel], seq_chunk [arbitrary / sequential]).
    # pre_ref : (Ts, B_tile, H_pad)  precomputed x_t @ W_ih^T for this chunk
    # whhT_ref: (H_pad, H_pad)       W_hh^T (pre-transposed, loop-invariant)
    # out_ref : (Ts, B_tile, H_pad)  hidden states for this chunk
    # h_scr   : (B_tile, H_pad)      hidden state carried across seq chunks
    c = pl.program_id(1)  # sequence-chunk index (inner, sequential axis)

    @pl.when(c == 0)
    def _():
        h_scr[...] = jnp.zeros_like(h_scr)  # h_0 = 0 per batch tile

    whhT = whhT_ref[...]      # hoisted, loop-invariant
    ts = pre_ref.shape[0]     # static chunk length

    def step(s, h):
        z = pre_ref[s] + jnp.dot(
            h, whhT,
            preferred_element_type=jnp.float32,
            precision=jax.lax.Precision.HIGHEST,  # exact f32 (1e-5 contract)
        )
        h_new = jnp.tanh(z)
        out_ref[s] = h_new  # (B_tile, H_pad) lane-dense store
        return h_new

    # Fixed partial unroll: scheduling win without code/vreg pressure blow-up.
    h_scr[...] = jax.lax.fori_loop(0, ts, step, h_scr[...], unroll=min(8, ts))


def _choose_ts(S: int, ts_max: int) -> int:
    """Chunk length: prefer a divisor of S (no dead serial tail work)."""
    ts_max = max(1, min(ts_max, S))
    if S <= ts_max:
        return S
    lo = max(1, ts_max // 2)
    for t in range(ts_max, lo - 1, -1):
        if S % t == 0:
            return t
    # TODO(synk): clamp the in-kernel trip count on the tail chunk instead of
    # padding (needs a dynamic fori_loop bound, which disables unroll).
    return ts_max


@functools.partial(jax.jit, static_argnames=("seq_chunk",))
def reservoir_forward(x, w_ih, w_hh, *, seq_chunk=128):
    """x: (batch, seq, input) f32, w_ih: (H, I), w_hh: (H, H) -> (batch, seq, H)."""
    B, S, I = x.shape
    H, I2 = w_ih.shape
    assert I2 == I and w_hh.shape == (H, H)

    f32 = jnp.float32
    x32 = x.astype(f32)
    w_ih32 = w_ih.astype(f32)
    w_hh32 = w_hh.astype(f32)

    H_pad = _round_up(H, 128)          # lane-dense hidden
    B_pad = _round_up(max(B, 8), 8)    # sublane-dense batch

    # Batch tile: bound the loop-carried h (<= ~32 vregs) and expose a
    # "parallel" grid axis for megacore (v7x) when the batch is large.
    cap = max(8, min(256, ((128 * 1024) // (H_pad * 4)) // 8 * 8))
    if B_pad <= cap:
        B_tile = B_pad
    else:
        B_tile = cap
        B_pad = _round_up(B_pad, B_tile)
    n_btiles = B_pad // B_tile

    # Size Ts from an explicit VMEM budget (fits under v7x's 64 MiB physical):
    # double-buffered pre + out chunk blocks, double-buffered weight, h scratch.
    budget = 40 * 1024 * 1024
    weight_bytes = 2 * H_pad * H_pad * 4
    scratch_bytes = B_tile * H_pad * 4
    per_ts = 4 * B_tile * H_pad * 4
    ts_vmem_max = max(1, (budget - weight_bytes - scratch_bytes) // per_ts)
    Ts = _choose_ts(S, min(seq_chunk, ts_vmem_max))
    S_pad = _round_up(S, Ts)
    n_chunks = S_pad // Ts

    vmem_needed = weight_bytes + scratch_bytes + per_ts * Ts
    vmem_limit = int(min(56 * 1024 * 1024,
                         max(16 * 1024 * 1024, vmem_needed + (8 << 20))))

    # Hoisted input projection. Padding is folded into the einsum operands, so
    # `pre` is produced directly at its padded, time-major (S_pad, B_pad, H_pad)
    # layout — no second full-tensor pad pass. Zero padding is exact here.
    x_p = jnp.pad(x32, ((0, B_pad - B), (0, S_pad - S), (0, 0)))
    w_ih_p = jnp.pad(w_ih32, ((0, H_pad - H), (0, 0)))
    pre_pad = jnp.einsum("bsi,hi->sbh", x_p, w_ih_p,
                         precision=jax.lax.Precision.HIGHEST)

    # Pre-transposed, zero-padded recurrent weights.
    whhT_pad = jnp.pad(w_hh32.T, ((0, H_pad - H), (0, H_pad - H)))

    out_pad = pl.pallas_call(
        _rnn_chunk_kernel,
        out_shape=jax.ShapeDtypeStruct((S_pad, B_pad, H_pad), f32),
        grid_spec=pltpu.PrefetchScalarGridSpec(
            num_scalar_prefetch=0,
            grid=(n_btiles, n_chunks),
            in_specs=[
                pl.BlockSpec((Ts, B_tile, H_pad), lambda b, c: (c, b, 0)),
                # Loop-invariant weight; constant index_map => never re-fetched.
                # (Could be single-buffered via pipeline_mode=pl.Buffered(1) to
                #  reclaim H_pad^2*4 bytes of VMEM at large H.)
                pl.BlockSpec((H_pad, H_pad), lambda b, c: (0, 0)),
            ],
            out_specs=pl.BlockSpec((Ts, B_tile, H_pad), lambda b, c: (c, b, 0)),
            scratch_shapes=[pltpu.VMEM((B_tile, H_pad), f32)],
        ),
        compiler_params=pltpu.CompilerParams(
            # Batch tiles independent -> parallel (megacore on v7x);
            # hidden state carried across seq chunks -> arbitrary.
            dimension_semantics=("parallel", "arbitrary"),
            vmem_limit_bytes=vmem_limit,
        ),
    )(pre_pad, whhT_pad)

    # Slice off padding; back to batch-first (batch, seq, hidden).
    return jnp.transpose(out_pad[:S, :B, :H], (1, 0, 2))


def reservoir_forward_ref(x, w_ih, w_hh):
    """Pure-JAX reference matching torch.nn.RNN (tanh, no bias, batch_first)."""
    B, S, I = x.shape
    H = w_ih.shape[0]
    hp = jax.lax.Precision.HIGHEST
    x_tm = jnp.transpose(x, (1, 0, 2)).astype(jnp.float32)

    def step(h, x_t):
        h_new = jnp.tanh(jnp.dot(x_t, w_ih.T, precision=hp)
                         + jnp.dot(h, w_hh.T, precision=hp))
        return h_new, h_new

    h0 = jnp.zeros((B, H), jnp.float32)
    _, out_tm = jax.lax.scan(step, h0, x_tm)
    return jnp.transpose(out_tm, (1, 0, 2))


if __name__ == "__main__":
    # Small shapes consistent with the module: batch=2, seq=8, input=4, hidden=32
    B, S, I, H = 2, 8, 4, 32

    key = jax.random.PRNGKey(0)
    kx, kih, khh = jax.random.split(key, 3)

    # Parameter init mimicking torch.nn.RNN default: U(-1/sqrt(H), 1/sqrt(H))
    bound = 1.0 / jnp.sqrt(jnp.float32(H))
    w_ih = jax.random.uniform(kih, (H, I), jnp.float32, -bound, bound)
    w_hh = jax.random.uniform(khh, (H, H), jnp.float32, -bound, bound)

    x = jax.random.normal(kx, (B, S, I), jnp.float32)

    out = reservoir_forward(x, w_ih, w_hh)
    out = jax.block_until_ready(out)

    ref = reservoir_forward_ref(x, w_ih, w_hh)
    assert out.shape == (B, S, H)
    assert jnp.allclose(out, ref, atol=1e-5, rtol=1e-5)

    print("KERNEL_OK")
</pallas_src>

<mosaic_0001>
module attributes {stable_mosaic.version = 11 : i64} {
  func.func @_rnn_chunk_kernel(%arg0: i32, %arg1: i32, %arg2: memref<8x8x128xf32, #tpu.memory_space<vmem>>, %arg3: memref<128x128xf32, #tpu.memory_space<vmem>>, %arg4: memref<8x8x128xf32, #tpu.memory_space<vmem>>, %arg5: memref<8x128xf32, #tpu.memory_space<vmem>>) attributes {dimension_semantics = [#tpu.dimension_semantics<parallel>, #tpu.dimension_semantics<arbitrary>], iteration_bounds = array<i64: 1, 1>, scalar_prefetch = 0 : i64, scratch_operands = 1 : i64, tpu.core_type = #tpu.core_type<tc>, window_params = [{transform_indices = @transform_0, window_bounds = array<i64: 8, 8, 128>}, {pipeline_mode = #tpu.pipeline_mode<synchronous>, transform_indices = @transform_1, window_bounds = array<i64: 128, 128>}, {transform_indices = @transform_2, window_bounds = array<i64: 8, 8, 128>}]} {
    %c0_i32 = arith.constant 0 : i32
    %0 = arith.cmpi eq, %arg1, %c0_i32 : i32
    %1 = arith.extui %0 : i1 to i32
    %c0_i32_0 = arith.constant 0 : i32
    %2 = arith.cmpi ne, %1, %c0_i32_0 : i32
    scf.if %2 {
      %cst_46 = arith.constant 0.000000e+00 : f32
      %86 = vector.broadcast %cst_46 : f32 to vector<8x128xf32>
      %c0_47 = arith.constant 0 : index
      %c0_48 = arith.constant 0 : index
      %87 = vector.load %arg5[%c0_47, %c0_48] : memref<8x128xf32, #tpu.memory_space<vmem>>, vector<8x128xf32>
      tpu.vector_store %arg5[%c0_47, %c0_48], %86 {strides = array<i32>} : memref<8x128xf32, #tpu.memory_space<vmem>>, vector<8x128xf32>,
    } else {
    }
    %c0 = arith.constant 0 : index
    %c0_1 = arith.constant 0 : index
    %3 = vector.load %arg3[%c0, %c0_1] : memref<128x128xf32, #tpu.memory_space<vmem>>, vector<128x128xf32>
    %c0_2 = arith.constant 0 : index
    %c0_3 = arith.constant 0 : index
    %4 = vector.load %arg5[%c0_2, %c0_3] : memref<8x128xf32, #tpu.memory_space<vmem>>, vector<8x128xf32>
    %c0_i32_4 = arith.constant 0 : i32
    %5 = arith.index_cast %c0_i32_4 : i32 to index
    %c0_5 = arith.constant 0 : index
    %c0_6 = arith.constant 0 : index
    %6 = vector.load %arg2[%5, %c0_5, %c0_6] : memref<8x8x128xf32, #tpu.memory_space<vmem>>, vector<1x8x128xf32>
    %7 = vector.shape_cast %6 : vector<1x8x128xf32> to vector<8x128xf32>
    %cst = arith.constant dense<0.000000e+00> : vector<8x128xf32>
    %8 = tpu.matmul %4, %3, %cst {dimension_numbers = #tpu.dot_dimension_numbers<[1], [0], [0], [1], [0, 0, 1, 1], [], []>, precision = #tpu.contract_precision<fp32>} : vector<8x128xf32>, vector<128x128xf32>, vector<8x128xf32> -> vector<8x128xf32>
    %9 = arith.addf %7, %8 : vector<8x128xf32>
    %10 = math.tanh %9 : vector<8x128xf32>
    %11 = arith.index_cast %c0_i32_4 : i32 to index
    %c0_7 = arith.constant 0 : index
    %c0_8 = arith.constant 0 : index
    %12 = vector.load %arg4[%11, %c0_7, %c0_8] : memref<8x8x128xf32, #tpu.memory_space<vmem>>, vector<1x8x128xf32>
    %13 = vector.shape_cast %12 : vector<1x8x128xf32> to vector<8x128xf32>
    %14 = vector.shape_cast %10 : vector<8x128xf32> to vector<1x8x128xf32>
    tpu.vector_store %arg4[%11, %c0_7, %c0_8], %14 {strides = array<i32>} : memref<8x8x128xf32, #tpu.memory_space<vmem>>, vector<1x8x128xf32>,
    %c1_i32 = arith.constant 1 : i32
    %15 = arith.index_cast %c1_i32 : i32 to index
    %c0_9 = arith.constant 0 : index
    %c0_10 = arith.constant 0 : index
    %16 = vector.load %arg2[%15, %c0_9, %c0_10] : memref<8x8x128xf32, #tpu.memory_space<vmem>>, vector<1x8x128xf32>
    %17 = vector.shape_cast %16 : vector<1x8x128xf32> to vector<8x128xf32>
    %cst_11 = arith.constant dense<0.000000e+00> : vector<8x128xf32>
    %18 = tpu.matmul %10, %3, %cst_11 {dimension_numbers = #tpu.dot_dimension_numbers<[1], [0], [0], [1], [0, 0, 1, 1], [], []>, precision = #tpu.contract_precision<fp32>} : vector<8x128xf32>, vector<128x128xf32>, vector<8x128xf32> -> vector<8x128xf32>
    %19 = arith.addf %17, %18 : vector<8x128xf32>
    %20 = math.tanh %19 : vector<8x128xf32>
    %21 = arith.index_cast %c1_i32 : i32 to index
    %c0_12 = arith.constant 0 : index
    %c0_13 = arith.constant 0 : index
    %22 = vector.load %arg4[%21, %c0_12, %c0_13] : memref<8x8x128xf32, #tpu.memory_space<vmem>>, vector<1x8x128xf32>
    %23 = vector.shape_cast %22 : vector<1x8x128xf32> to vector<8x128xf32>
    %24 = vector.shape_cast %20 : vector<8x128xf32> to vector<1x8x128xf32>
    tpu.vector_store %arg4[%21, %c0_12, %c0_13], %24 {strides = array<i32>} : memref<8x8x128xf32, #tpu.memory_space<vmem>>, vector<1x8x128xf32>,
    %c2_i32 = arith.constant 2 : i32
    %25 = arith.index_cast %c2_i32 : i32 to index
    %c0_14 = arith.constant 0 : index
    %c0_15 = arith.constant 0 : index
    %26 = vector.load %arg2[%25, %c0_14, %c0_15] : memref<8x8x128xf32, #tpu.memory_space<vmem>>, vector<1x8x128xf32>
    %27 = vector.shape_cast %26 : vector<1x8x128xf32> to vector<8x128xf32>
    %cst_16 = arith.constant dense<0.000000e+00> : vector<8x128xf32>
    %28 = tpu.matmul %20, %3, %cst_16 {dimension_numbers = #tpu.dot_dimension_numbers<[1], [0], [0], [1], [0, 0, 1, 1], [], []>, precision = #tpu.contract_precision<fp32>} : vector<8x128xf32>, vector<128x128xf32>, vector<8x128xf32> -> vector<8x128xf32>
    %29 = arith.addf %27, %28 : vector<8x128xf32>
    %30 = math.tanh %29 : vector<8x128xf32>
    %31 = arith.index_cast %c2_i32 : i32 to index
    %c0_17 = arith.constant 0 : index
    %c0_18 = arith.constant 0 : index
    %32 = vector.load %arg4[%31, %c0_17, %c0_18] : memref<8x8x128xf32, #tpu.memory_space<vmem>>, vector<1x8x128xf32>
    %33 = vector.shape_cast %32 : vector<1x8x128xf32> to vector<8x128xf32>
    %34 = vector.shape_cast %30 : vector<8x128xf32> to vector<1x8x128xf32>
    tpu.vector_store %arg4[%31, %c0_17, %c0_18], %34 {strides = array<i32>} : memref<8x8x128xf32, #tpu.memory_space<vmem>>, vector<1x8x128xf32>,
    %c3_i32 = arith.constant 3 : i32
    %35 = arith.index_cast %c3_i32 : i32 to index
    %c0_19 = arith.constant 0 : index
    %c0_20 = arith.constant 0 : index
    %36 = vector.load %arg2[%35, %c0_19, %c0_20] : memref<8x8x128xf32, #tpu.memory_space<vmem>>, vector<1x8x128xf32>
    %37 = vector.shape_cast %36 : vector<1x8x128xf32> to vector<8x128xf32>
    %cst_21 = arith.constant dense<0.000000e+00> : vector<8x128xf32>
    %38 = tpu.matmul %30, %3, %cst_21 {dimension_numbers = #tpu.dot_dimension_numbers<[1], [0], [0], [1], [0, 0, 1, 1], [], []>, precision = #tpu.contract_precision<fp32>} : vector<8x128xf32>, vector<128x128xf32>, vector<8x128xf32> -> vector<8x128xf32>
    %39 = arith.addf %37, %38 : vector<8x128xf32>
    %40 = math.tanh %39 : vector<8x128xf32>
    %41 = arith.index_cast %c3_i32 : i32 to index
    %c0_22 = arith.constant 0 : index
    %c0_23 = arith.constant 0 : index
    %42 = vector.load %arg4[%41, %c0_22, %c0_23] : memref<8x8x128xf32, #tpu.memory_space<vmem>>, vector<1x8x128xf32>
    %43 = vector.shape_cast %42 : vector<1x8x128xf32> to vector<8x128xf32>
    %44 = vector.shape_cast %40 : vector<8x128xf32> to vector<1x8x128xf32>
    tpu.vector_store %arg4[%41, %c0_22, %c0_23], %44 {strides = array<i32>} : memref<8x8x128xf32, #tpu.memory_space<vmem>>, vector<1x8x128xf32>,
    %c4_i32 = arith.constant 4 : i32
    %45 = arith.index_cast %c4_i32 : i32 to index
    %c0_24 = arith.constant 0 : index
    %c0_25 = arith.constant 0 : index
    %46 = vector.load %arg2[%45, %c0_24, %c0_25] : memref<8x8x128xf32, #tpu.memory_space<vmem>>, vector<1x8x128xf32>
    %47 = vector.shape_cast %46 : vector<1x8x128xf32> to vector<8x128xf32>
    %cst_26 = arith.constant dense<0.000000e+00> : vector<8x128xf32>
    %48 = tpu.matmul %40, %3, %cst_26 {dimension_numbers = #tpu.dot_dimension_numbers<[1], [0], [0], [1], [0, 0, 1, 1], [], []>, precision = #tpu.contract_precision<fp32>} : vector<8x128xf32>, vector<128x128xf32>, vector<8x128xf32> -> vector<8x128xf32>
    %49 = arith.addf %47, %48 : vector<8x128xf32>
    %50 = math.tanh %49 : vector<8x128xf32>
    %51 = arith.index_cast %c4_i32 : i32 to index
    %c0_27 = arith.constant 0 : index
    %c0_28 = arith.constant 0 : index
    %52 = vector.load %arg4[%51, %c0_27, %c0_28] : memref<8x8x128xf32, #tpu.memory_space<vmem>>, vector<1x8x128xf32>
    %53 = vector.shape_cast %52 : vector<1x8x128xf32> to vector<8x128xf32>
    %54 = vector.shape_cast %50 : vector<8x128xf32> to vector<1x8x128xf32>
    tpu.vector_store %arg4[%51, %c0_27, %c0_28], %54 {strides = array<i32>} : memref<8x8x128xf32, #tpu.memory_space<vmem>>, vector<1x8x128xf32>,
    %c5_i32 = arith.constant 5 : i32
    %55 = arith.index_cast %c5_i32 : i32 to index
    %c0_29 = arith.constant 0 : index
    %c0_30 = arith.constant 0 : index
    %56 = vector.load %arg2[%55, %c0_29, %c0_30] : memref<8x8x128xf32, #tpu.memory_space<vmem>>, vector<1x8x128xf32>
    %57 = vector.shape_cast %56 : vector<1x8x128xf32> to vector<8x128xf32>
    %cst_31 = arith.constant dense<0.000000e+00> : vector<8x128xf32>
    %58 = tpu.matmul %50, %3, %cst_31 {dimension_numbers = #tpu.dot_dimension_numbers<[1], [0], [0], [1], [0, 0, 1, 1], [], []>, precision = #tpu.contract_precision<fp32>} : vector<8x128xf32>, vector<128x128xf32>, vector<8x128xf32> -> vector<8x128xf32>
    %59 = arith.addf %57, %58 : vector<8x128xf32>
    %60 = math.tanh %59 : vector<8x128xf32>
    %61 = arith.index_cast %c5_i32 : i32 to index
    %c0_32 = arith.constant 0 : index
    %c0_33 = arith.constant 0 : index
    %62 = vector.load %arg4[%61, %c0_32, %c0_33] : memref<8x8x128xf32, #tpu.memory_space<vmem>>, vector<1x8x128xf32>
    %63 = vector.shape_cast %62 : vector<1x8x128xf32> to vector<8x128xf32>
    %64 = vector.shape_cast %60 : vector<8x128xf32> to vector<1x8x128xf32>
    tpu.vector_store %arg4[%61, %c0_32, %c0_33], %64 {strides = array<i32>} : memref<8x8x128xf32, #tpu.memory_space<vmem>>, vector<1x8x128xf32>,
    %c6_i32 = arith.constant 6 : i32
    %65 = arith.index_cast %c6_i32 : i32 to index
    %c0_34 = arith.constant 0 : index
    %c0_35 = arith.constant 0 : index
    %66 = vector.load %arg2[%65, %c0_34, %c0_35] : memref<8x8x128xf32, #tpu.memory_space<vmem>>, vector<1x8x128xf32>
    %67 = vector.shape_cast %66 : vector<1x8x128xf32> to vector<8x128xf32>
    %cst_36 = arith.constant dense<0.000000e+00> : vector<8x128xf32>
    %68 = tpu.matmul %60, %3, %cst_36 {dimension_numbers = #tpu.dot_dimension_numbers<[1], [0], [0], [1], [0, 0, 1, 1], [], []>, precision = #tpu.contract_precision<fp32>} : vector<8x128xf32>, vector<128x128xf32>, vector<8x128xf32> -> vector<8x128xf32>
    %69 = arith.addf %67, %68 : vector<8x128xf32>
    %70 = math.tanh %69 : vector<8x128xf32>
    %71 = arith.index_cast %c6_i32 : i32 to index
    %c0_37 = arith.constant 0 : index
    %c0_38 = arith.constant 0 : index
    %72 = vector.load %arg4[%71, %c0_37, %c0_38] : memref<8x8x128xf32, #tpu.memory_space<vmem>>, vector<1x8x128xf32>
    %73 = vector.shape_cast %72 : vector<1x8x128xf32> to vector<8x128xf32>
    %74 = vector.shape_cast %70 : vector<8x128xf32> to vector<1x8x128xf32>
    tpu.vector_store %arg4[%71, %c0_37, %c0_38], %74 {strides = array<i32>} : memref<8x8x128xf32, #tpu.memory_space<vmem>>, vector<1x8x128xf32>,
    %c7_i32 = arith.constant 7 : i32
    %75 = arith.index_cast %c7_i32 : i32 to index
    %c0_39 = arith.constant 0 : index
    %c0_40 = arith.constant 0 : index
    %76 = vector.load %arg2[%75, %c0_39, %c0_40] : memref<8x8x128xf32, #tpu.memory_space<vmem>>, vector<1x8x128xf32>
    %77 = vector.shape_cast %76 : vector<1x8x128xf32> to vector<8x128xf32>
    %cst_41 = arith.constant dense<0.000000e+00> : vector<8x128xf32>
    %78 = tpu.matmul %70, %3, %cst_41 {dimension_numbers = #tpu.dot_dimension_numbers<[1], [0], [0], [1], [0, 0, 1, 1], [], []>, precision = #tpu.contract_precision<fp32>} : vector<8x128xf32>, vector<128x128xf32>, vector<8x128xf32> -> vector<8x128xf32>
    %79 = arith.addf %77, %78 : vector<8x128xf32>
    %80 = math.tanh %79 : vector<8x128xf32>
    %81 = arith.index_cast %c7_i32 : i32 to index
    %c0_42 = arith.constant 0 : index
    %c0_43 = arith.constant 0 : index
    %82 = vector.load %arg4[%81, %c0_42, %c0_43] : memref<8x8x128xf32, #tpu.memory_space<vmem>>, vector<1x8x128xf32>
    %83 = vector.shape_cast %82 : vector<1x8x128xf32> to vector<8x128xf32>
    %84 = vector.shape_cast %80 : vector<8x128xf32> to vector<1x8x128xf32>
    tpu.vector_store %arg4[%81, %c0_42, %c0_43], %84 {strides = array<i32>} : memref<8x8x128xf32, #tpu.memory_space<vmem>>, vector<1x8x128xf32>,
    %c8_i32 = arith.constant 8 : i32
    %c0_44 = arith.constant 0 : index
    %c0_45 = arith.constant 0 : index
    %85 = vector.load %arg5[%c0_44, %c0_45] : memref<8x128xf32, #tpu.memory_space<vmem>>, vector<8x128xf32>
    tpu.vector_store %arg5[%c0_44, %c0_45], %80 {strides = array<i32>} : memref<8x128xf32, #tpu.memory_space<vmem>>, vector<8x128xf32>,
    return
  }
  func.func @transform_0(%arg0: i32, %arg1: i32) -> (i32, i32, i32) {
    %c0_i32 = arith.constant 0 : i32
    %c0_i32_0 = arith.constant 0 : i32
    return %arg1, %arg0, %c0_i32 : i32, i32, i32
  }
  func.func @transform_1(%arg0: i32, %arg1: i32) -> (i32, i32) {
    %c0_i32 = arith.constant 0 : i32
    %c0_i32_0 = arith.constant 0 : i32
    %c0_i32_1 = arith.constant 0 : i32
    return %c0_i32, %c0_i32_0 : i32, i32
  }
  func.func @transform_2(%arg0: i32, %arg1: i32) -> (i32, i32, i32) {
    %c0_i32 = arith.constant 0 : i32
    %c0_i32_0 = arith.constant 0 : i32
    return %arg1, %arg0, %c0_i32 : i32, i32, i32
  }
}

</mosaic_0001>

<bundles_post_ra>
// kernel: reservoir_forward.1
= control target key start
LH: loop header
LB: loop body
LE: loop exit
PB: predicated region body
PF: predicated region fallthrough
CT: control target
= control target key end

     0   :  { %s3921_s1 = inlined_call_operand.vmem [shape: f32[128,128], index: 1, kind: input, shape index: {}]   ;;  %s3922_s0 = inlined_call_operand.vmem [shape: f32[8,8,128], index: 0, kind: input, shape index: {}]   ;;  %s3923_s2 = inlined_call_operand.vmem [shape: f32[8,8,128], index: 2, kind: output, shape index: {}]  }
   0x1   :  { %v31_v0 = vld [vmem:[%s3921_s1 + $0x78] sm:$0xff]  ;;  %v30_v1 = vld [vmem:[%s3921_s1 + $0x70] sm:$0xff]  ;;  %v29_v2 = vld [vmem:[%s3921_s1 + $0x68] sm:$0xff] }
   0x2   :  { %v2868_v3 = vand.u32 4294901760, %v31_v0  ;;  %v2870_v4 = vand.u32 4294901760, %v30_v1  ;;  %v2872_v5 = vand.u32 4294901760, %v29_v2  ;;  %v28_v6 = vld [vmem:[%s3921_s1 + $0x60] sm:$0xff]  ;;  %v27_v7 = vld [vmem:[%s3921_s1 + $0x58] sm:$0xff]  ;;  %v26_v8 = vld [vmem:[%s3921_s1 + $0x50] sm:$0xff] }
   0x3   :  { %v2883_v9 = vand.u32 4294901760, %v28_v6  ;;  %v2885_v10 = vand.u32 4294901760, %v27_v7  ;;  %v2887_v11 = vand.u32 4294901760, %v26_v8  ;;  %v25_v12 = vld [vmem:[%s3921_s1 + $0x48] sm:$0xff]  ;;  %v24_v13 = vld [vmem:[%s3921_s1 + $0x40] sm:$0xff]  ;;  %v23_v18 = vld [vmem:[%s3921_s1 + $0x38] sm:$0xff] }
   0x4   :  { %35 = vmatpush.msra.mxu0 %v2868_v3  ;;  %v2897_v14 = vsub.f32 %v31_v0, %v2868_v3  ;;  %v2900_v15 = vsub.f32 %v30_v1, %v2870_v4  ;;  %v2903_v16 = vsub.f32 %v29_v2, %v2872_v5  ;;  %v2905_v17 = vand.u32 4294901760, %v25_v12  ;;  %231 = vmatpush.msra.mxu3 %v2868_v3  ;;  %v22_v26 = vld [vmem:[%s3921_s1 + $0x30] sm:$0xff]  ;;  %v21_v36 = vld [vmem:[%s3921_s1 + $0x28] sm:$0xff]  ;;  %v20_v42 = vld [vmem:[%s3921_s1 + $0x20] sm:$0xff] }
   0x5   :  { %v2912_v19 = vsub.f32 %v28_v6, %v2883_v9  ;;  %v2915_v20 = vsub.f32 %v27_v7, %v2885_v10  ;;  %v2918_v21 = vsub.f32 %v26_v8, %v2887_v11  ;;  %v2930_v25 = vand.u32 4294901760, %v24_v13  ;;  %v19_v48 = vld [vmem:[%s3921_s1 + $0x18] sm:$0xff]  ;;  %v18_v54 = vld [vmem:[%s3921_s1 + $0x10] sm:$0xff]  ;;  %v17_v60 = vld [vmem:[%s3921_s1 + $0x8] sm:$0xff] }
   0x6   :  { %37 = vmatpush.msra.mxu0 %v2870_v4  ;;  %v2922_v22 = vand.u32 4294901760, %v2897_v14  ;;  %v2925_v23 = vand.u32 4294901760, %v2900_v15  ;;  %v2928_v24 = vand.u32 4294901760, %v2903_v16  ;;  %178 = vmatpush.msra.mxu2 %v2897_v14  ;;  %v2939_v28 = vand.u32 4294901760, %v23_v18  ;;  %v16_v1 = vld [vmem:[%s3921_s1] sm:$0xff] }
   0x7   :  { %v2937_v27 = vand.u32 4294901760, %v2912_v19  ;;  %v2942_v29 = vsub.f32 %v25_v12, %v2905_v17  ;;  %233 = vmatpush.msra.mxu3 %v2870_v4  ;;  %v2953_v33 = vand.u32 4294901760, %v2915_v20  ;;  %v2957_v34 = vand.u32 4294901760, %v2918_v21 }
   0x8   :  { %39 = vmatpush.msra.mxu0 %v2872_v5  ;;  %v78_v30 = vsub.f32 %v2897_v14, %v2922_v22  ;;  %v84_v31 = vsub.f32 %v2900_v15, %v2925_v23  ;;  %v90_v32 = vsub.f32 %v2903_v16, %v2928_v24  ;;  %181 = vmatpush.msra.mxu2 %v2900_v15  ;;  %v2959_v35 = vand.u32 4294901760, %v22_v26 }
   0x9   :  { %235 = vmatpush.msra.mxu3 %v2872_v5  ;;  %v96_v39 = vsub.f32 %v2912_v19, %v2937_v27  ;;  %v2973_v40 = vsub.f32 %v24_v13, %v2930_v25  ;;  %v2977_v41 = vand.u32 4294901760, %v2942_v29  ;;  %v102_v44 = vsub.f32 %v2915_v20, %v2953_v33 }
   0xa   :  { %v2965_v37 = vand.u32 4294901760, %v78_v30  ;;  %41 = vmatpush.msra.mxu0 %v2883_v9  ;;  %v2968_v38 = vand.u32 4294901760, %v84_v31  ;;  %184 = vmatpush.msra.mxu2 %v2903_v16  ;;  %v2985_v43 = vand.u32 4294901760, %v90_v32  ;;  %v2989_v45 = vand.u32 4294901760, %v21_v36 }
   0xb   :  { %237 = vmatpush.msra.mxu3 %v2883_v9  ;;  %v2992_v46 = vsub.f32 %v23_v18, %v2939_v28  ;;  %v108_v47 = vsub.f32 %v2918_v21, %v2957_v34  ;;  %v3003_v49 = vand.u32 4294901760, %v96_v39  ;;  %v3006_v50 = vand.u32 4294901760, %v2973_v40 }
   0xc   :  { %80 = vmatpush.msra.mxu1 %v2965_v37  ;;  %43 = vmatpush.msra.mxu0 %v2885_v10  ;;  %v3008_v51 = vand.u32 4294901760, %v20_v42  ;;  %v3011_v52 = vsub.f32 %v22_v26, %v2959_v35  ;;  %v114_v53 = vsub.f32 %v2942_v29, %v2977_v41  ;;  %v3022_v55 = vand.u32 4294901760, %v102_v44 }
   0xd   :  { %187 = vmatpush.msra.mxu2 %v2912_v19  ;;  %239 = vmatpush.msra.mxu3 %v2885_v10  ;;  %3960 = vst [vmem:[#allocation3_spill] sm:$0xff] %v3003_v49  ;;  %v3025_v56 = vand.u32 4294901760, %v2992_v46  ;;  %v3027_v57 = vand.u32 4294901760, %v19_v48  ;;  %v3030_v58 = vsub.f32 %v21_v36, %v2989_v45  ;;  %v3032_v59 = vand.u32 4294901760, %v108_v47 }
   0xe   :  { %86 = vmatpush.msra.mxu1 %v2968_v38  ;;  %45 = vmatpush.msra.mxu0 %v2887_v11  ;;  %3961 = vst [vmem:[#allocation4_spill] sm:$0xff] %v3022_v55  ;;  %v120_v61 = vsub.f32 %v2973_v40, %v3006_v50  ;;  %v3044_v62 = vand.u32 4294901760, %v3011_v52  ;;  %v3046_v63 = vand.u32 4294901760, %v18_v54  ;;  %v3049_v0 = vsub.f32 %v20_v42, %v3008_v51 }
   0xf   :  { %190 = vmatpush.msra.mxu2 %v2915_v20  ;;  %241 = vmatpush.msra.mxu3 %v2887_v11  ;;  %3962 = vst [vmem:[#allocation5_spill] sm:$0xff] %v3032_v59  ;;  %v3054_v2 = vand.u32 4294901760, %v114_v53  ;;  %v126_v6 = vsub.f32 %v2992_v46, %v3025_v56  ;;  %v3063_v7 = vand.u32 4294901760, %v3030_v58  ;;  %v3065_v8 = vand.u32 4294901760, %v17_v60 }
  0x10   :  { %92 = vmatpush.msra.mxu1 %v2985_v43  ;;  %47 = vmatpush.msra.mxu0 %v2905_v17  ;;  %3963 = vst [vmem:[#allocation6_spill] sm:$0xff] %v3049_v0  ;;  %v3068_v12 = vsub.f32 %v19_v48, %v3027_v57  ;;  %v3070_v13 = vand.u32 4294901760, %v16_v1  ;;  %v3076_v18 = vand.u32 4294901760, %v120_v61  ;;  %v132_v26 = vsub.f32 %v3011_v52, %v3044_v62 }
  0x11   :  { %193 = vmatpush.msra.mxu2 %v2918_v21  ;;  %243 = vmatpush.msra.mxu3 %v2905_v17  ;;  %3964 = vst [vmem:[#allocation7_spill] sm:$0xff] %v3054_v2  ;;  %v3081_v30 = vand.u32 4294901760, %v3049_v0  ;;  %v3084_v31 = vsub.f32 %v18_v54, %v3046_v63  ;;  %v3090_v32 = vand.u32 4294901760, %v126_v6  ;;  %v138_v36 = vsub.f32 %v3030_v58, %v3063_v7 }
  0x12   :  { %98 = vmatpush.msra.mxu1 %v3003_v49  ;;  %49 = vmatpush.msra.mxu0 %v2930_v25  ;;  %3965 = vst [vmem:[#allocation8_spill] sm:$0xff] %v3068_v12  ;;  %v3095_v39 = vand.u32 4294901760, %v3068_v12  ;;  %v3098_v42 = vsub.f32 %v17_v60, %v3065_v8  ;;  %v3104_v44 = vand.u32 4294901760, %v132_v26  ;;  %v3112_v53 = vsub.f32 %v16_v1, %v3070_v13 }
  0x13   :  { %196 = vmatpush.msra.mxu2 %v2942_v29  ;;  %245 = vmatpush.msra.mxu3 %v2930_v25  ;;  %3966 = vst [vmem:[#allocation9_spill] sm:$0xff] %v3076_v18  ;;  %v144_v47 = vsub.f32 %v3049_v0, %v3081_v30  ;;  %v3109_v48 = vand.u32 4294901760, %v3084_v31  ;;  %v3118_v54 = vand.u32 4294901760, %v138_v36 }
  0x14   :  { %104 = vmatpush.msra.mxu1 %v3022_v55  ;;  %51 = vmatpush.msra.mxu0 %v2939_v28  ;;  %3967 = vst [vmem:[#allocation10_spill] sm:$0xff] %v3084_v31  ;;  %v150_v60 = vsub.f32 %v3068_v12, %v3095_v39  ;;  %v3123_v61 = vand.u32 4294901760, %v3098_v42  ;;  %v3134_v26 = vand.u32 4294901760, %v3112_v53 }
  0x15   :  { %199 = vmatpush.msra.mxu2 %v2973_v40  ;;  %247 = vmatpush.msra.mxu3 %v2939_v28  ;;  %3968 = vst [vmem:[#allocation11_spill] sm:$0xff] %v3090_v32  ;;  %v3129_v1 = vand.u32 4294901760, %v144_v47  ;;  %v156_v6 = vsub.f32 %v3084_v31, %v3109_v48 }
  0x16   :  { %110 = vmatpush.msra.mxu1 %v3032_v59  ;;  %53 = vmatpush.msra.mxu0 %v2959_v35  ;;  %3969 = vst [vmem:[#allocation12_spill] sm:$0xff] %v3104_v44  ;;  %v3140_v36 = vand.u32 4294901760, %v150_v60  ;;  %v162_v47 = vsub.f32 %v3098_v42, %v3123_v61 }
  0x17   :  { %202 = vmatpush.msra.mxu2 %v2992_v46  ;;  %249 = vmatpush.msra.mxu3 %v2959_v35  ;;  %3970 = vst [vmem:[#allocation13_spill] sm:$0xff] %v3112_v53 }
  0x18   :  { %116 = vmatpush.msra.mxu1 %v3054_v2  ;;  %55 = vmatpush.msra.mxu0 %v2989_v45  ;;  %3971 = vst [vmem:[#allocation14_spill] sm:$0xff] %v3118_v54  ;;  %v3155_v60 = vand.u32 4294901760, %v162_v47 }
  0x19   :  { %205 = vmatpush.msra.mxu2 %v3011_v52  ;;  %251 = vmatpush.msra.mxu3 %v2989_v45  ;;  %3972 = vst [vmem:[#allocation15_spill] sm:$0xff] %v3129_v1 }
  0x1a   :  { %122 = vmatpush.msra.mxu1 %v3076_v18  ;;  %57 = vmatpush.msra.mxu0 %v3008_v51  ;;  %3973 = vst [vmem:[#allocation16_spill] sm:$0xff] %v3134_v26 }
  0x1b   :  { %208 = vmatpush.msra.mxu2 %v3030_v58  ;;  %253 = vmatpush.msra.mxu3 %v3008_v51  ;;  %3974 = vst [vmem:[#allocation17_spill] sm:$0xff] %v3140_v36  ;;  %v3980_v47 = vld [vmem:[#allocation10_spill] sm:$0xff] }
  0x1c   :  { %128 = vmatpush.msra.mxu1 %v3090_v32  ;;  %59 = vmatpush.msra.mxu0 %v3027_v57  ;;  %3976 = vst [vmem:[#allocation19_spill] sm:$0xff] %v3155_v60 }
  0x1d   :  { %211 = vmatpush.msra.mxu2 %v3049_v0  ;;  %255 = vmatpush.msra.mxu3 %v3027_v57  ;;  %v168_v0 = vsub.f32 %v3112_v53, %v3134_v26 }
  0x1e   :  { %134 = vmatpush.msra.mxu1 %v3104_v44  ;;  %61 = vmatpush.msra.mxu0 %v3046_v63 }
  0x1f   :  { %214 = vmatpush.msra.mxu2 %v3068_v12  ;;  %257 = vmatpush.msra.mxu3 %v3046_v63  ;;  %v3148_v12 = vand.u32 4294901760, %v156_v6  ;;  %v3161_v6 = vand.u32 4294901760, %v168_v0  ;;  %v3978_v0 = vld [vmem:[#allocation6_spill] sm:$0xff] }
  0x20   :  { %140 = vmatpush.msra.mxu1 %v3118_v54  ;;  %63 = vmatpush.msra.mxu0 %v3065_v8 }
  0x21   :  { %217 = vmatpush.msra.mxu2 %v3084_v31  ;;  %259 = vmatpush.msra.mxu3 %v3065_v8  ;;  %3975 = vst [vmem:[#allocation18_spill] sm:$0xff] %v3148_v12  ;;  %v2843_v31 = vmov 0.0  }
  0x22   :  { %146 = vmatpush.msra.mxu1 %v3129_v1  ;;  %65 = vmatpush.msra.mxu0 %v3070_v13  ;;  %3977 = vst [vmem:[#allocation20_spill] sm:$0xff] %v3161_v6 }
  0x23   :  { %220 = vmatpush.msra.mxu2 %v3098_v42  ;;  %261 = vmatpush.msra.mxu3 %v3070_v13 }
  0x24   :  { %272 = vmatpush.msrb.mxu0 %v2922_v22  ;;  %152 = vmatpush.msra.mxu1 %v3140_v36 }
  0x25   :  { %223 = vmatpush.msra.mxu2 %v3112_v53  ;;  %265 = vmatmul.f32.vlgmr.msra.gmra.mxu3 %v2843_v31 }
  0x26   :  { %276 = vmatpush.msrb.mxu0 %v2925_v23  ;;  %158 = vmatpush.msra.mxu1 %v3148_v12 }
  0x27   :  { %226 = vmatmul.f32.vlgmr.msra.gmra.mxu2 %v2843_v31  ;;  %71 = vmatmul.f32.vlgmr.msra.gmra.mxu0 %v2843_v31 }
  0x28   :  { %280 = vmatpush.msrb.mxu0 %v2928_v24  ;;  %164 = vmatpush.msra.mxu1 %v3155_v60 }
  0x29   :  { %426 = vmatpush.msrb.mxu3 %v2965_v37  ;;  %381 = vmatpush.msrb.mxu2 %v2868_v3 }
  0x2a   :  { %284 = vmatpush.msrb.mxu0 %v2937_v27  ;;  %170 = vmatpush.msra.mxu1 %v3161_v6 }
  0x2b   :  { %172 = vmatmul.f32.vlgmr.msra.gmra.mxu1 %v2843_v31  ;;  %432 = vmatpush.msrb.mxu3 %v2968_v38 }
  0x2c   :  { %339 = vmatpush.msrb.mxu1 %v2868_v3  ;;  %288 = vmatpush.msrb.mxu0 %v2953_v33 }
  0x2d   :  { %438 = vmatpush.msrb.mxu3 %v2985_v43  ;;  %383 = vmatpush.msrb.mxu2 %v2870_v4 }
  0x2e   :  { %341 = vmatpush.msrb.mxu1 %v2870_v4  ;;  %292 = vmatpush.msrb.mxu0 %v2957_v34 }
  0x2f   :  { %444 = vmatpush.msrb.mxu3 %v3003_v49  ;;  %385 = vmatpush.msrb.mxu2 %v2872_v5 }
  0x30   :  { %343 = vmatpush.msrb.mxu1 %v2872_v5  ;;  %296 = vmatpush.msrb.mxu0 %v2977_v41 }
  0x31   :  { %450 = vmatpush.msrb.mxu3 %v3022_v55  ;;  %387 = vmatpush.msrb.mxu2 %v2883_v9 }
  0x32   :  { %345 = vmatpush.msrb.mxu1 %v2883_v9  ;;  %300 = vmatpush.msrb.mxu0 %v3006_v50 }
  0x33   :  { %456 = vmatpush.msrb.mxu3 %v3032_v59  ;;  %389 = vmatpush.msrb.mxu2 %v2885_v10 }
  0x34   :  { %347 = vmatpush.msrb.mxu1 %v2885_v10  ;;  %304 = vmatpush.msrb.mxu0 %v3025_v56 }
  0x35   :  { %462 = vmatpush.msrb.mxu3 %v3054_v2  ;;  %391 = vmatpush.msrb.mxu2 %v2887_v11 }
  0x36   :  { %349 = vmatpush.msrb.mxu1 %v2887_v11  ;;  %308 = vmatpush.msrb.mxu0 %v3044_v62 }
  0x37   :  { %468 = vmatpush.msrb.mxu3 %v3076_v18  ;;  %393 = vmatpush.msrb.mxu2 %v2905_v17 }
  0x38   :  { %351 = vmatpush.msrb.mxu1 %v2905_v17  ;;  %312 = vmatpush.msrb.mxu0 %v3063_v7 }
  0x39   :  { %474 = vmatpush.msrb.mxu3 %v3090_v32  ;;  %395 = vmatpush.msrb.mxu2 %v2930_v25 }
  0x3a   :  { %353 = vmatpush.msrb.mxu1 %v2930_v25  ;;  %316 = vmatpush.msrb.mxu0 %v3081_v30 }
  0x3b   :  { %480 = vmatpush.msrb.mxu3 %v3104_v44  ;;  %397 = vmatpush.msrb.mxu2 %v2939_v28 }
  0x3c   :  { %355 = vmatpush.msrb.mxu1 %v2939_v28  ;;  %320 = vmatpush.msrb.mxu0 %v3095_v39 }
  0x3d   :  { %486 = vmatpush.msrb.mxu3 %v3118_v54  ;;  %399 = vmatpush.msrb.mxu2 %v2959_v35 }
  0x3e   :  { %357 = vmatpush.msrb.mxu1 %v2959_v35  ;;  %324 = vmatpush.msrb.mxu0 %v3109_v48 }
  0x3f   :  { %492 = vmatpush.msrb.mxu3 %v3129_v1  ;;  %401 = vmatpush.msrb.mxu2 %v2989_v45 }
  0x40   :  { %359 = vmatpush.msrb.mxu1 %v2989_v45  ;;  %328 = vmatpush.msrb.mxu0 %v3123_v61 }
  0x41   :  { %498 = vmatpush.msrb.mxu3 %v3140_v36  ;;  %403 = vmatpush.msrb.mxu2 %v3008_v51 }
  0x42   :  { %361 = vmatpush.msrb.mxu1 %v3008_v51  ;;  %332 = vmatpush.msrb.mxu0 %v3134_v26 }
  0x43   :  { %334 = vmatmul.f32.vlgmr.msrb.gmra.mxu0 %v2843_v31  ;;  %504 = vmatpush.msrb.mxu3 %v3148_v12 }
  0x44   :  { %363 = vmatpush.msrb.mxu1 %v3027_v57  ;;  %524 = vmatpush.msra.mxu0 %v2897_v14 }
  0x45   :  { %510 = vmatpush.msrb.mxu3 %v3155_v60  ;;  %405 = vmatpush.msrb.mxu2 %v3027_v57 }
  0x46   :  { %365 = vmatpush.msrb.mxu1 %v3046_v63  ;;  %527 = vmatpush.msra.mxu0 %v2900_v15 }
  0x47   :  { %516 = vmatpush.msrb.mxu3 %v3161_v6  ;;  %407 = vmatpush.msrb.mxu2 %v3046_v63 }
  0x48   :  { %367 = vmatpush.msrb.mxu1 %v3065_v8  ;;  %530 = vmatpush.msra.mxu0 %v2903_v16 }
  0x49   :  { %685 = vmatpush.msra.mxu3 %v2868_v3  ;;  %409 = vmatpush.msrb.mxu2 %v3065_v8 }
  0x4a   :  { %369 = vmatpush.msrb.mxu1 %v3070_v13  ;;  %533 = vmatpush.msra.mxu0 %v2912_v19 }
  0x4b   :  { %371 = vmatmul.f32.vlgmr.msrb.gmra.mxu1 %v2843_v31  ;;  %687 = vmatpush.msra.mxu3 %v2870_v4  ;;  %v3979_v31 = vld [vmem:[#allocation8_spill] sm:$0xff] }
  0x4c   :  { %577 = vmatpush.msra.mxu1 %v2868_v3  ;;  %536 = vmatpush.msra.mxu0 %v2915_v20 }
  0x4d   :  { %689 = vmatpush.msra.mxu3 %v2872_v5  ;;  %411 = vmatpush.msrb.mxu2 %v3070_v13 }
  0x4e   :  { %579 = vmatpush.msra.mxu1 %v2870_v4  ;;  %539 = vmatpush.msra.mxu0 %v2918_v21 }
  0x4f   :  { %691 = vmatpush.msra.mxu3 %v2883_v9  ;;  %618 = vmatpush.msra.mxu2 %v2922_v22 }
  0x50   :  { %581 = vmatpush.msra.mxu1 %v2872_v5  ;;  %542 = vmatpush.msra.mxu0 %v2942_v29 }
  0x51   :  { %693 = vmatpush.msra.mxu3 %v2885_v10  ;;  %622 = vmatpush.msra.mxu2 %v2925_v23 }
  0x52   :  { %583 = vmatpush.msra.mxu1 %v2883_v9  ;;  %545 = vmatpush.msra.mxu0 %v2973_v40 }
  0x53   :  { %695 = vmatpush.msra.mxu3 %v2887_v11  ;;  %626 = vmatpush.msra.mxu2 %v2928_v24 }
  0x54   :  { %585 = vmatpush.msra.mxu1 %v2885_v10  ;;  %548 = vmatpush.msra.mxu0 %v2992_v46 }
  0x55   :  { %697 = vmatpush.msra.mxu3 %v2905_v17  ;;  %630 = vmatpush.msra.mxu2 %v2937_v27 }
  0x56   :  { %587 = vmatpush.msra.mxu1 %v2887_v11  ;;  %551 = vmatpush.msra.mxu0 %v3011_v52 }
  0x57   :  { %699 = vmatpush.msra.mxu3 %v2930_v25  ;;  %634 = vmatpush.msra.mxu2 %v2953_v33 }
  0x58   :  { %589 = vmatpush.msra.mxu1 %v2905_v17  ;;  %554 = vmatpush.msra.mxu0 %v3030_v58 }
  0x59   :  { %701 = vmatpush.msra.mxu3 %v2939_v28  ;;  %638 = vmatpush.msra.mxu2 %v2957_v34 }
  0x5a   :  { %591 = vmatpush.msra.mxu1 %v2930_v25  ;;  %557 = vmatpush.msra.mxu0 %v3978_v0 }
  0x5b   :  { %703 = vmatpush.msra.mxu3 %v2959_v35  ;;  %642 = vmatpush.msra.mxu2 %v2977_v41 }
  0x5c   :  { %593 = vmatpush.msra.mxu1 %v2939_v28  ;;  %560 = vmatpush.msra.mxu0 %v3979_v31 }
  0x5d   :  { %705 = vmatpush.msra.mxu3 %v2989_v45  ;;  %646 = vmatpush.msra.mxu2 %v3006_v50 }
  0x5e   :  { %595 = vmatpush.msra.mxu1 %v2959_v35  ;;  %563 = vmatpush.msra.mxu0 %v3980_v47 }
  0x5f   :  { %707 = vmatpush.msra.mxu3 %v3008_v51  ;;  %650 = vmatpush.msra.mxu2 %v3025_v56 }
  0x60   :  { %597 = vmatpush.msra.mxu1 %v2989_v45  ;;  %566 = vmatpush.msra.mxu0 %v3098_v42 }
  0x61   :  { %709 = vmatpush.msra.mxu3 %v3027_v57  ;;  %654 = vmatpush.msra.mxu2 %v3044_v62 }
  0x62   :  { %599 = vmatpush.msra.mxu1 %v3008_v51  ;;  %569 = vmatpush.msra.mxu0 %v3112_v53 }
  0x63   :  { %711 = vmatpush.msra.mxu3 %v3046_v63  ;;  %658 = vmatpush.msra.mxu2 %v3063_v7 }
  0x64   :  { %601 = vmatpush.msra.mxu1 %v3027_v57  ;;  %728 = vmatpush.msrb.mxu0 %v2868_v3 }
  0x65   :  { %713 = vmatpush.msra.mxu3 %v3065_v8  ;;  %662 = vmatpush.msra.mxu2 %v3081_v30 }
  0x66   :  { %603 = vmatpush.msra.mxu1 %v3046_v63  ;;  %730 = vmatpush.msrb.mxu0 %v2870_v4 }
  0x67   :  { %715 = vmatpush.msra.mxu3 %v3070_v13  ;;  %666 = vmatpush.msra.mxu2 %v3095_v39 }
  0x68   :  { %605 = vmatpush.msra.mxu1 %v3065_v8  ;;  %732 = vmatpush.msrb.mxu0 %v2872_v5 }
  0x69   :  { %670 = vmatpush.msra.mxu2 %v3109_v48 }
  0x6a   :  { %607 = vmatpush.msra.mxu1 %v3070_v13  ;;  %734 = vmatpush.msrb.mxu0 %v2883_v9 }
  0x6b   :  { %674 = vmatpush.msra.mxu2 %v3123_v61 }
  0x6c   :  { %773 = vmatpush.msrb.mxu1 %v2965_v37  ;;  %736 = vmatpush.msrb.mxu0 %v2885_v10 }
  0x6d   :  { %678 = vmatpush.msra.mxu2 %v3134_v26 }
  0x6e   :  { %779 = vmatpush.msrb.mxu1 %v2968_v38  ;;  %738 = vmatpush.msrb.mxu0 %v2887_v11 }
  0x70   :  { %785 = vmatpush.msrb.mxu1 %v2985_v43  ;;  %740 = vmatpush.msrb.mxu0 %v2905_v17 }
  0x72   :  { %791 = vmatpush.msrb.mxu1 %v3003_v49  ;;  %742 = vmatpush.msrb.mxu0 %v2930_v25 }
  0x74   :  { %797 = vmatpush.msrb.mxu1 %v3022_v55  ;;  %744 = vmatpush.msrb.mxu0 %v2939_v28 }
  0x76   :  { %803 = vmatpush.msrb.mxu1 %v3032_v59  ;;  %746 = vmatpush.msrb.mxu0 %v2959_v35 }
  0x78   :  { %809 = vmatpush.msrb.mxu1 %v3054_v2  ;;  %748 = vmatpush.msrb.mxu0 %v2989_v45 }
  0x7a   :  { %815 = vmatpush.msrb.mxu1 %v3076_v18  ;;  %750 = vmatpush.msrb.mxu0 %v3008_v51 }
  0x7c   :  { %821 = vmatpush.msrb.mxu1 %v3090_v32  ;;  %752 = vmatpush.msrb.mxu0 %v3027_v57 }
  0x7e   :  { %827 = vmatpush.msrb.mxu1 %v3104_v44  ;;  %754 = vmatpush.msrb.mxu0 %v3046_v63 }
  0x80   :  { %833 = vmatpush.msrb.mxu1 %v3118_v54  ;;  %756 = vmatpush.msrb.mxu0 %v3065_v8 }
  0x82   :  { %839 = vmatpush.msrb.mxu1 %v3129_v1  ;;  %758 = vmatpush.msrb.mxu0 %v3070_v13  ;;  %v33_v1 = vld [vmem:[%s3922_s0] sm:$0xff] }
  0x84   :  { %845 = vmatpush.msrb.mxu1 %v3140_v36 }
  0x86   :  { %851 = vmatpush.msrb.mxu1 %v3148_v12 }
  0x88   :  { %857 = vmatpush.msrb.mxu1 %v3155_v60 }
  0x8a   :  { %863 = vmatpush.msrb.mxu1 %v3161_v6 }
  0xa4   :  { %v72_v44 = vpop.f32.mrf.mxu0 }
  0xa8   :  { %v173_v32 = vpop.f32.mrf.mxu1  ;;  %v266_v54 = vpop.f32.mrf.mxu3 }
  0xa9   :  { %v174_v18 = vadd.f32 %v173_v32, %v72_v44  ;;  %v3983_v44 = vld [vmem:[#allocation3_spill] sm:$0xff] }
  0xaa   :  { %v227_v2 = vpop.f32.mrf.mxu2 }
  0xab   :  { %v228_v59 = vadd.f32 %v227_v2, %v174_v18  ;;  %v3982_v18 = vld [vmem:[#allocation13_spill] sm:$0xff] }
  0xad   :  { %v267_v55 = vadd.f32 %v266_v54, %v228_v59  ;;  %v3985_v54 = vld [vmem:[#allocation5_spill] sm:$0xff] }
  0xc0   :  { %v335_v49 = vpop.f32.mrf.mxu0 }
  0xc1   :  { %v336_v53 = vadd.f32 %v335_v49, %v267_v55 }
  0xc8   :  { %v372_v36 = vpop.f32.mrf.mxu1 }
  0xc9   :  { %v373_v26 = vadd.f32 %v372_v36, %v336_v53  ;;  %v3984_v53 = vld [vmem:[#allocation4_spill] sm:$0xff]  ;;  %v3988_v36 = vld [vmem:[#allocation11_spill] sm:$0xff] }
  0xcb   :  { %v375_v12 = vadd.f32 %v373_v26, %v33_v1  ;;  %v3986_v1 = vld [vmem:[#allocation7_spill] sm:$0xff]  ;;  %v3987_v26 = vld [vmem:[#allocation9_spill] sm:$0xff] }
  0xcd   :  { %2827 = vtanh.f32 %v375_v12  ;;  %v3981_v12 = vld [vmem:[#allocation16_spill] sm:$0xff] }
  0xd3   :  { %v2828_v60 = vpop.eup %2827 }
  0xd4   :  { %377 = vst [vmem:[%s3923_s2] sm:$0xff] %v2828_v60  ;;  %v412_v32 = vand.u32 4294901760, %v2828_v60 }
  0xd6   :  { %518 = vmatmul.f32.vlgmr.msrb.gmra.mxu3 %v412_v32  ;;  %v413_v2 = vsub.f32 %v2828_v60, %v412_v32  ;;  %v3989_v60 = vld [vmem:[#allocation12_spill] sm:$0xff] }
  0xd7   :  { %924 = vmatpush.msrb.mxu3 %v2868_v3 }
  0xd8   :  { %572 = vmatmul.f32.vlgmr.msra.gmra.mxu0 %v413_v2  ;;  %v414_v49 = vand.u32 4294901760, %v413_v2 }
  0xd9   :  { %926 = vmatpush.msrb.mxu3 %v2870_v4  ;;  %965 = vmatpush.msra.mxu0 %v2922_v22 }
  0xda   :  { %611 = vmatmul.f32.vlgmr.msra.gmra.mxu1 %v414_v49  ;;  %v415_v55 = vsub.f32 %v413_v2, %v414_v49  ;;  %v3991_v2 = vld [vmem:[#allocation15_spill] sm:$0xff]  ;;  %v3992_v49 = vld [vmem:[#allocation17_spill] sm:$0xff] }
  0xdb   :  { %928 = vmatpush.msrb.mxu3 %v2872_v5  ;;  %1032 = vmatpush.msra.mxu1 %v2868_v3 }
  0xdc   :  { %v416_v59 = vand.u32 4294901760, %v415_v55  ;;  %969 = vmatpush.msra.mxu0 %v2925_v23  ;;  %v3993_v55 = vld [vmem:[#allocation18_spill] sm:$0xff] }
  0xdd   :  { %930 = vmatpush.msrb.mxu3 %v2883_v9  ;;  %1034 = vmatpush.msra.mxu1 %v2870_v4 }
  0xde   :  { %417 = vmatmul.f32.vlgmr.msrb.gmra.mxu2 %v416_v59  ;;  %717 = vmatmul.f32.vlgmr.msra.gmra.mxu3 %v412_v32  ;;  %v3994_v59 = vld [vmem:[#allocation19_spill] sm:$0xff] }
  0xdf   :  { %871 = vmatpush.msrb.mxu2 %v2897_v14  ;;  %932 = vmatpush.msrb.mxu3 %v2885_v10 }
  0xe0   :  { %1036 = vmatpush.msra.mxu1 %v2872_v5  ;;  %973 = vmatpush.msra.mxu0 %v2928_v24 }
  0xe1   :  { %874 = vmatpush.msrb.mxu2 %v2900_v15  ;;  %934 = vmatpush.msrb.mxu3 %v2887_v11 }
  0xe2   :  { %1038 = vmatpush.msra.mxu1 %v2883_v9  ;;  %977 = vmatpush.msra.mxu0 %v2937_v27 }
  0xe3   :  { %877 = vmatpush.msrb.mxu2 %v2903_v16  ;;  %936 = vmatpush.msrb.mxu3 %v2905_v17 }
  0xe4   :  { %1040 = vmatpush.msra.mxu1 %v2885_v10  ;;  %981 = vmatpush.msra.mxu0 %v2953_v33 }
  0xe5   :  { %880 = vmatpush.msrb.mxu2 %v2912_v19  ;;  %938 = vmatpush.msrb.mxu3 %v2930_v25 }
  0xe6   :  { %680 = vmatmul.f32.vlgmr.msra.gmra.mxu2 %v412_v32  ;;  %1042 = vmatpush.msra.mxu1 %v2887_v11  ;;  %v3990_v32 = vld [vmem:[#allocation14_spill] sm:$0xff] }
  0xe7   :  { %883 = vmatpush.msrb.mxu2 %v2915_v20  ;;  %940 = vmatpush.msrb.mxu3 %v2939_v28 }
  0xe8   :  { %1044 = vmatpush.msra.mxu1 %v2905_v17  ;;  %985 = vmatpush.msra.mxu0 %v2957_v34 }
  0xe9   :  { %886 = vmatpush.msrb.mxu2 %v2918_v21  ;;  %942 = vmatpush.msrb.mxu3 %v2959_v35 }
  0xea   :  { %1046 = vmatpush.msra.mxu1 %v2930_v25  ;;  %989 = vmatpush.msra.mxu0 %v2977_v41 }
  0xeb   :  { %889 = vmatpush.msrb.mxu2 %v2942_v29  ;;  %944 = vmatpush.msrb.mxu3 %v2989_v45 }
  0xec   :  { %1048 = vmatpush.msra.mxu1 %v2939_v28  ;;  %993 = vmatpush.msra.mxu0 %v3006_v50 }
  0xed   :  { %892 = vmatpush.msrb.mxu2 %v2973_v40  ;;  %946 = vmatpush.msrb.mxu3 %v3008_v51 }
  0xee   :  { %1050 = vmatpush.msra.mxu1 %v2959_v35  ;;  %997 = vmatpush.msra.mxu0 %v3025_v56 }
  0xef   :  { %895 = vmatpush.msrb.mxu2 %v2992_v46  ;;  %948 = vmatpush.msrb.mxu3 %v3027_v57 }
  0xf0   :  { %1052 = vmatpush.msra.mxu1 %v2989_v45  ;;  %1001 = vmatpush.msra.mxu0 %v3044_v62 }
  0xf1   :  { %898 = vmatpush.msrb.mxu2 %v3011_v52  ;;  %950 = vmatpush.msrb.mxu3 %v3046_v63 }
  0xf2   :  { %1054 = vmatpush.msra.mxu1 %v3008_v51  ;;  %1005 = vmatpush.msra.mxu0 %v3063_v7 }
  0xf3   :  { %901 = vmatpush.msrb.mxu2 %v3030_v58  ;;  %952 = vmatpush.msrb.mxu3 %v3065_v8 }
  0xf4   :  { %1056 = vmatpush.msra.mxu1 %v3027_v57  ;;  %1009 = vmatpush.msra.mxu0 %v3081_v30 }
  0xf5   :  { %904 = vmatpush.msrb.mxu2 %v3978_v0  ;;  %954 = vmatpush.msrb.mxu3 %v3070_v13 }
  0xf6   :  { %1058 = vmatpush.msra.mxu1 %v3046_v63  ;;  %1013 = vmatpush.msra.mxu0 %v3095_v39 }
  0xf7   :  { %907 = vmatpush.msrb.mxu2 %v3979_v31  ;;  %1120 = vmatpush.msra.mxu3 %v2965_v37 }
  0xf8   :  { %1060 = vmatpush.msra.mxu1 %v3065_v8  ;;  %1017 = vmatpush.msra.mxu0 %v3109_v48 }
  0xf9   :  { %910 = vmatpush.msrb.mxu2 %v3980_v47  ;;  %1126 = vmatpush.msra.mxu3 %v2968_v38 }
  0xfa   :  { %1062 = vmatpush.msra.mxu1 %v3070_v13  ;;  %1021 = vmatpush.msra.mxu0 %v3123_v61 }
  0xfb   :  { %913 = vmatpush.msrb.mxu2 %v3098_v42  ;;  %1132 = vmatpush.msra.mxu3 %v2985_v43 }
  0xfc   :  { %1025 = vmatpush.msra.mxu0 %v3981_v12 }
  0xfd   :  { %916 = vmatpush.msrb.mxu2 %v3982_v18  ;;  %1138 = vmatpush.msra.mxu3 %v3983_v44 }
  0xff   :  { %1075 = vmatpush.msra.mxu2 %v2868_v3  ;;  %1144 = vmatpush.msra.mxu3 %v3984_v53 }
 0x101   :  { %1077 = vmatpush.msra.mxu2 %v2870_v4  ;;  %1150 = vmatpush.msra.mxu3 %v3985_v54 }
 0x103   :  { %1079 = vmatpush.msra.mxu2 %v2872_v5  ;;  %1156 = vmatpush.msra.mxu3 %v3986_v1 }
 0x105   :  { %1081 = vmatpush.msra.mxu2 %v2883_v9  ;;  %1162 = vmatpush.msra.mxu3 %v3987_v26 }
 0x107   :  { %1083 = vmatpush.msra.mxu2 %v2885_v10  ;;  %1168 = vmatpush.msra.mxu3 %v3988_v36 }
 0x109   :  { %1085 = vmatpush.msra.mxu2 %v2887_v11  ;;  %1174 = vmatpush.msra.mxu3 %v3989_v60 }
 0x10b   :  { %1087 = vmatpush.msra.mxu2 %v2905_v17  ;;  %1180 = vmatpush.msra.mxu3 %v3990_v32 }
 0x10d   :  { %1089 = vmatpush.msra.mxu2 %v2930_v25  ;;  %1186 = vmatpush.msra.mxu3 %v3991_v2 }
 0x10f   :  { %1091 = vmatpush.msra.mxu2 %v2939_v28  ;;  %1192 = vmatpush.msra.mxu3 %v3992_v49 }
 0x111   :  { %1093 = vmatpush.msra.mxu2 %v2959_v35  ;;  %1198 = vmatpush.msra.mxu3 %v3993_v55 }
 0x113   :  { %1095 = vmatpush.msra.mxu2 %v2989_v45  ;;  %1204 = vmatpush.msra.mxu3 %v3994_v59 }
 0x115   :  { %1097 = vmatpush.msra.mxu2 %v3008_v51  ;;  %1210 = vmatpush.msra.mxu3 %v3161_v6  ;;  %v2812_v6 = vld [vmem:[%s3922_s0 + $0x8] sm:$0xff] }
 0x117   :  { %1099 = vmatpush.msra.mxu2 %v3027_v57 }
 0x119   :  { %1101 = vmatpush.msra.mxu2 %v3046_v63 }
 0x11b   :  { %1103 = vmatpush.msra.mxu2 %v3065_v8 }
 0x11d   :  { %1105 = vmatpush.msra.mxu2 %v3070_v13 }
 0x155   :  { %v573_v55 = vpop.f32.mrf.mxu0 }
 0x157   :  { %v612_v36 = vpop.f32.mrf.mxu1 }
 0x159   :  { %v519_v49 = vpop.f32.mrf.mxu3 }
 0x161   :  { %v418_v2 = vpop.f32.mrf.mxu2  ;;  %v718_v54 = vpop.f32.mrf.mxu3 }
 0x162   :  { %v520_v32 = vadd.f32 %v519_v49, %v418_v2  ;;  %v4001_v49 = vld [vmem:[#allocation11_spill] sm:$0xff] }
 0x164   :  { %v574_v60 = vadd.f32 %v573_v55, %v520_v32  ;;  %v4002_v55 = vld [vmem:[#allocation12_spill] sm:$0xff] }
 0x166   :  { %v613_v26 = vadd.f32 %v612_v36, %v574_v60  ;;  %v3999_v36 = vld [vmem:[#allocation7_spill] sm:$0xff]  ;;  %v4000_v60 = vld [vmem:[#allocation9_spill] sm:$0xff] }
 0x169   :  { %v681_v59 = vpop.f32.mrf.mxu2 }
 0x16a   :  { %v682_v1 = vadd.f32 %v681_v59, %v613_v26  ;;  %v4003_v59 = vld [vmem:[#allocation14_spill] sm:$0xff] }
 0x16c   :  { %v719_v53 = vadd.f32 %v718_v54, %v682_v1  ;;  %v3998_v1 = vld [vmem:[#allocation5_spill] sm:$0xff] }
 0x16e   :  { %v721_v44 = vadd.f32 %v2812_v6, %v719_v53  ;;  %v3997_v53 = vld [vmem:[#allocation4_spill] sm:$0xff] }
 0x170   :  { %2829 = vtanh.f32 %v721_v44  ;;  %v3996_v44 = vld [vmem:[#allocation3_spill] sm:$0xff] }
 0x176   :  { %v2830_v18 = vpop.eup %2829 }
 0x177   :  { %2813 = vst [vmem:[%s3923_s2 + $0x8] sm:$0xff] %v2830_v18  ;;  %v759_v2 = vand.u32 4294901760, %v2830_v18 }
 0x179   :  { %865 = vmatmul.f32.vlgmr.msrb.gmra.mxu1 %v759_v2  ;;  %v760_v32 = vsub.f32 %v2830_v18, %v759_v2  ;;  %v3995_v18 = vld [vmem:[#allocation13_spill] sm:$0xff] }
 0x17a   :  { %1271 = vmatpush.msrb.mxu1 %v2868_v3 }
 0x17b   :  { %919 = vmatmul.f32.vlgmr.msrb.gmra.mxu2 %v760_v32  ;;  %v761_v26 = vand.u32 4294901760, %v760_v32 }
 0x17c   :  { %1273 = vmatpush.msrb.mxu1 %v2870_v4  ;;  %1312 = vmatpush.msrb.mxu2 %v2922_v22 }
 0x17d   :  { %958 = vmatmul.f32.vlgmr.msrb.gmra.mxu3 %v761_v26  ;;  %v762_v54 = vsub.f32 %v760_v32, %v761_v26  ;;  %v4005_v32 = vld [vmem:[#allocation17_spill] sm:$0xff]  ;;  %v4006_v26 = vld [vmem:[#allocation18_spill] sm:$0xff] }
 0x17e   :  { %1275 = vmatpush.msrb.mxu1 %v2872_v5  ;;  %1379 = vmatpush.msrb.mxu3 %v2868_v3 }
 0x17f   :  { %v763_v6 = vand.u32 4294901760, %v762_v54  ;;  %1316 = vmatpush.msrb.mxu2 %v2925_v23  ;;  %v4007_v54 = vld [vmem:[#allocation19_spill] sm:$0xff] }
 0x180   :  { %1277 = vmatpush.msrb.mxu1 %v2883_v9  ;;  %1381 = vmatpush.msrb.mxu3 %v2870_v4 }
 0x181   :  { %764 = vmatmul.f32.vlgmr.msrb.gmra.mxu0 %v763_v6  ;;  %1064 = vmatmul.f32.vlgmr.msra.gmra.mxu1 %v759_v2  ;;  %v4008_v6 = vld [vmem:[#allocation20_spill] sm:$0xff] }
 0x182   :  { %1218 = vmatpush.msrb.mxu0 %v2897_v14  ;;  %1279 = vmatpush.msrb.mxu1 %v2885_v10 }
 0x183   :  { %1383 = vmatpush.msrb.mxu3 %v2872_v5  ;;  %1320 = vmatpush.msrb.mxu2 %v2928_v24 }
 0x184   :  { %1221 = vmatpush.msrb.mxu0 %v2900_v15  ;;  %1281 = vmatpush.msrb.mxu1 %v2887_v11 }
 0x185   :  { %1385 = vmatpush.msrb.mxu3 %v2883_v9  ;;  %1324 = vmatpush.msrb.mxu2 %v2937_v27 }
 0x186   :  { %1224 = vmatpush.msrb.mxu0 %v2903_v16  ;;  %1283 = vmatpush.msrb.mxu1 %v2905_v17 }
 0x187   :  { %1387 = vmatpush.msrb.mxu3 %v2885_v10  ;;  %1328 = vmatpush.msrb.mxu2 %v2953_v33 }
 0x188   :  { %1227 = vmatpush.msrb.mxu0 %v2912_v19  ;;  %1285 = vmatpush.msrb.mxu1 %v2930_v25 }
 0x189   :  { %1027 = vmatmul.f32.vlgmr.msra.gmra.mxu0 %v759_v2  ;;  %1389 = vmatpush.msrb.mxu3 %v2887_v11  ;;  %v4004_v2 = vld [vmem:[#allocation15_spill] sm:$0xff] }
 0x18a   :  { %1230 = vmatpush.msrb.mxu0 %v2915_v20  ;;  %1287 = vmatpush.msrb.mxu1 %v2939_v28 }
 0x18b   :  { %1391 = vmatpush.msrb.mxu3 %v2905_v17  ;;  %1332 = vmatpush.msrb.mxu2 %v2957_v34 }
 0x18c   :  { %1233 = vmatpush.msrb.mxu0 %v2918_v21  ;;  %1289 = vmatpush.msrb.mxu1 %v2959_v35 }
 0x18d   :  { %1393 = vmatpush.msrb.mxu3 %v2930_v25  ;;  %1336 = vmatpush.msrb.mxu2 %v2977_v41 }
 0x18e   :  { %1236 = vmatpush.msrb.mxu0 %v2942_v29  ;;  %1291 = vmatpush.msrb.mxu1 %v2989_v45 }
 0x18f   :  { %1395 = vmatpush.msrb.mxu3 %v2939_v28  ;;  %1340 = vmatpush.msrb.mxu2 %v3006_v50 }
 0x190   :  { %1239 = vmatpush.msrb.mxu0 %v2973_v40  ;;  %1293 = vmatpush.msrb.mxu1 %v3008_v51 }
 0x191   :  { %1397 = vmatpush.msrb.mxu3 %v2959_v35  ;;  %1344 = vmatpush.msrb.mxu2 %v3025_v56 }
 0x192   :  { %1242 = vmatpush.msrb.mxu0 %v2992_v46  ;;  %1295 = vmatpush.msrb.mxu1 %v3027_v57 }
 0x193   :  { %1399 = vmatpush.msrb.mxu3 %v2989_v45  ;;  %1348 = vmatpush.msrb.mxu2 %v3044_v62 }
 0x194   :  { %1245 = vmatpush.msrb.mxu0 %v3011_v52  ;;  %1297 = vmatpush.msrb.mxu1 %v3046_v63 }
 0x195   :  { %1401 = vmatpush.msrb.mxu3 %v3008_v51  ;;  %1352 = vmatpush.msrb.mxu2 %v3063_v7 }
 0x196   :  { %1248 = vmatpush.msrb.mxu0 %v3030_v58  ;;  %1299 = vmatpush.msrb.mxu1 %v3065_v8 }
 0x197   :  { %1403 = vmatpush.msrb.mxu3 %v3027_v57  ;;  %1356 = vmatpush.msrb.mxu2 %v3081_v30 }
 0x198   :  { %1251 = vmatpush.msrb.mxu0 %v3978_v0  ;;  %1301 = vmatpush.msrb.mxu1 %v3070_v13 }
 0x199   :  { %1405 = vmatpush.msrb.mxu3 %v3046_v63  ;;  %1360 = vmatpush.msrb.mxu2 %v3095_v39 }
 0x19a   :  { %1254 = vmatpush.msrb.mxu0 %v3979_v31  ;;  %1467 = vmatpush.msra.mxu1 %v2965_v37 }
 0x19b   :  { %1407 = vmatpush.msrb.mxu3 %v3065_v8  ;;  %1364 = vmatpush.msrb.mxu2 %v3109_v48 }
 0x19c   :  { %1257 = vmatpush.msrb.mxu0 %v3980_v47  ;;  %1473 = vmatpush.msra.mxu1 %v2968_v38 }
 0x19d   :  { %1409 = vmatpush.msrb.mxu3 %v3070_v13  ;;  %1368 = vmatpush.msrb.mxu2 %v3123_v61 }
 0x19e   :  { %1260 = vmatpush.msrb.mxu0 %v3098_v42  ;;  %1479 = vmatpush.msra.mxu1 %v2985_v43 }
 0x19f   :  { %1372 = vmatpush.msrb.mxu2 %v3981_v12 }
 0x1a0   :  { %1263 = vmatpush.msrb.mxu0 %v3995_v18  ;;  %1485 = vmatpush.msra.mxu1 %v3996_v44 }
 0x1a2   :  { %1422 = vmatpush.msra.mxu0 %v2868_v3  ;;  %1491 = vmatpush.msra.mxu1 %v3997_v53 }
 0x1a4   :  { %1424 = vmatpush.msra.mxu0 %v2870_v4  ;;  %1497 = vmatpush.msra.mxu1 %v3998_v1 }
 0x1a6   :  { %1426 = vmatpush.msra.mxu0 %v2872_v5  ;;  %1503 = vmatpush.msra.mxu1 %v3999_v36 }
 0x1a8   :  { %1428 = vmatpush.msra.mxu0 %v2883_v9  ;;  %1509 = vmatpush.msra.mxu1 %v4000_v60 }
 0x1aa   :  { %1430 = vmatpush.msra.mxu0 %v2885_v10  ;;  %1515 = vmatpush.msra.mxu1 %v4001_v49 }
 0x1ac   :  { %1432 = vmatpush.msra.mxu0 %v2887_v11  ;;  %1521 = vmatpush.msra.mxu1 %v4002_v55 }
 0x1ae   :  { %1434 = vmatpush.msra.mxu0 %v2905_v17  ;;  %1527 = vmatpush.msra.mxu1 %v4003_v59 }
 0x1b0   :  { %1436 = vmatpush.msra.mxu0 %v2930_v25  ;;  %1533 = vmatpush.msra.mxu1 %v4004_v2 }
 0x1b2   :  { %1438 = vmatpush.msra.mxu0 %v2939_v28  ;;  %1539 = vmatpush.msra.mxu1 %v4005_v32 }
 0x1b4   :  { %1440 = vmatpush.msra.mxu0 %v2959_v35  ;;  %1545 = vmatpush.msra.mxu1 %v4006_v26 }
 0x1b6   :  { %1442 = vmatpush.msra.mxu0 %v2989_v45  ;;  %1551 = vmatpush.msra.mxu1 %v4007_v54 }
 0x1b8   :  { %1444 = vmatpush.msra.mxu0 %v3008_v51  ;;  %1557 = vmatpush.msra.mxu1 %v4008_v6  ;;  %v2814_v6 = vld [vmem:[%s3922_s0 + $0x10] sm:$0xff] }
 0x1ba   :  { %1446 = vmatpush.msra.mxu0 %v3027_v57 }
 0x1bc   :  { %1448 = vmatpush.msra.mxu0 %v3046_v63 }
 0x1be   :  { %1450 = vmatpush.msra.mxu0 %v3065_v8 }
 0x1c0   :  { %1452 = vmatpush.msra.mxu0 %v3070_v13 }
 0x1f6   :  { %v866_v32 = vpop.f32.mrf.mxu1 }
 0x1fe   :  { %v765_v2 = vpop.f32.mrf.mxu0  ;;  %v920_v26 = vpop.f32.mrf.mxu2 }
 0x1ff   :  { %v867_v59 = vadd.f32 %v866_v32, %v765_v2  ;;  %v1065_v1 = vpop.f32.mrf.mxu1  ;;  %v4014_v32 = vld [vmem:[#allocation9_spill] sm:$0xff] }
 0x200   :  { %v959_v49 = vpop.f32.mrf.mxu3 }
 0x201   :  { %v921_v55 = vadd.f32 %v920_v26, %v867_v59  ;;  %v4015_v26 = vld [vmem:[#allocation11_spill] sm:$0xff] }
 0x203   :  { %v960_v60 = vadd.f32 %v959_v49, %v921_v55  ;;  %v4012_v49 = vld [vmem:[#allocation5_spill] sm:$0xff]  ;;  %v4013_v55 = vld [vmem:[#allocation7_spill] sm:$0xff] }
 0x206   :  { %v1028_v54 = vpop.f32.mrf.mxu0 }
 0x207   :  { %v1029_v36 = vadd.f32 %v1028_v54, %v960_v60  ;;  %v4016_v54 = vld [vmem:[#allocation12_spill] sm:$0xff] }
 0x209   :  { %v1066_v53 = vadd.f32 %v1065_v1, %v1029_v36  ;;  %v4011_v36 = vld [vmem:[#allocation4_spill] sm:$0xff] }
 0x20b   :  { %v1068_v44 = vadd.f32 %v2814_v6, %v1066_v53  ;;  %v4010_v53 = vld [vmem:[#allocation3_spill] sm:$0xff]  ;;  %v4017_v6 = vld [vmem:[#allocation14_spill] sm:$0xff] }
 0x20d   :  { %2831 = vtanh.f32 %v1068_v44 }
 0x213   :  { %v2832_v18 = vpop.eup %2831 }
 0x214   :  { %2815 = vst [vmem:[%s3923_s2 + $0x10] sm:$0xff] %v2832_v18  ;;  %v1106_v2 = vand.u32 4294901760, %v2832_v18 }
 0x216   :  { %1212 = vmatmul.f32.vlgmr.msra.gmra.mxu3 %v1106_v2  ;;  %v1107_v59 = vsub.f32 %v2832_v18, %v1106_v2  ;;  %v4009_v18 = vld [vmem:[#allocation13_spill] sm:$0xff] }
 0x217   :  { %1618 = vmatpush.msra.mxu3 %v2868_v3 }
 0x218   :  { %1266 = vmatmul.f32.vlgmr.msrb.gmra.mxu0 %v1107_v59  ;;  %v1108_v60 = vand.u32 4294901760, %v1107_v59 }
 0x219   :  { %1620 = vmatpush.msra.mxu3 %v2870_v4  ;;  %1659 = vmatpush.msrb.mxu0 %v2922_v22 }
 0x21a   :  { %1305 = vmatmul.f32.vlgmr.msrb.gmra.mxu1 %v1108_v60  ;;  %v1109_v1 = vsub.f32 %v1107_v59, %v1108_v60  ;;  %v4019_v59 = vld [vmem:[#allocation17_spill] sm:$0xff]  ;;  %v4020_v60 = vld [vmem:[#allocation18_spill] sm:$0xff] }
 0x21b   :  { %1622 = vmatpush.msra.mxu3 %v2872_v5  ;;  %1726 = vmatpush.msrb.mxu1 %v2868_v3 }
 0x21c   :  { %v1110_v44 = vand.u32 4294901760, %v1109_v1  ;;  %1663 = vmatpush.msrb.mxu0 %v2925_v23  ;;  %v4021_v1 = vld [vmem:[#allocation19_spill] sm:$0xff] }
 0x21d   :  { %1624 = vmatpush.msra.mxu3 %v2883_v9  ;;  %1728 = vmatpush.msrb.mxu1 %v2870_v4 }
 0x21e   :  { %1111 = vmatmul.f32.vlgmr.msra.gmra.mxu2 %v1110_v44  ;;  %1411 = vmatmul.f32.vlgmr.msrb.gmra.mxu3 %v1106_v2  ;;  %v4022_v44 = vld [vmem:[#allocation20_spill] sm:$0xff] }
 0x21f   :  { %1565 = vmatpush.msra.mxu2 %v2897_v14  ;;  %1626 = vmatpush.msra.mxu3 %v2885_v10 }
 0x220   :  { %1730 = vmatpush.msrb.mxu1 %v2872_v5  ;;  %1667 = vmatpush.msrb.mxu0 %v2928_v24 }
 0x221   :  { %1568 = vmatpush.msra.mxu2 %v2900_v15  ;;  %1628 = vmatpush.msra.mxu3 %v2887_v11 }
 0x222   :  { %1732 = vmatpush.msrb.mxu1 %v2883_v9  ;;  %1671 = vmatpush.msrb.mxu0 %v2937_v27 }
 0x223   :  { %1571 = vmatpush.msra.mxu2 %v2903_v16  ;;  %1630 = vmatpush.msra.mxu3 %v2905_v17 }
 0x224   :  { %1734 = vmatpush.msrb.mxu1 %v2885_v10  ;;  %1675 = vmatpush.msrb.mxu0 %v2953_v33 }
 0x225   :  { %1574 = vmatpush.msra.mxu2 %v2912_v19  ;;  %1632 = vmatpush.msra.mxu3 %v2930_v25 }
 0x226   :  { %1374 = vmatmul.f32.vlgmr.msrb.gmra.mxu2 %v1106_v2  ;;  %1736 = vmatpush.msrb.mxu1 %v2887_v11  ;;  %v4018_v2 = vld [vmem:[#allocation15_spill] sm:$0xff] }
 0x227   :  { %1577 = vmatpush.msra.mxu2 %v2915_v20  ;;  %1634 = vmatpush.msra.mxu3 %v2939_v28 }
 0x228   :  { %1738 = vmatpush.msrb.mxu1 %v2905_v17  ;;  %1679 = vmatpush.msrb.mxu0 %v2957_v34 }
 0x229   :  { %1580 = vmatpush.msra.mxu2 %v2918_v21  ;;  %1636 = vmatpush.msra.mxu3 %v2959_v35 }
 0x22a   :  { %1740 = vmatpush.msrb.mxu1 %v2930_v25  ;;  %1683 = vmatpush.msrb.mxu0 %v2977_v41 }
 0x22b   :  { %1583 = vmatpush.msra.mxu2 %v2942_v29  ;;  %1638 = vmatpush.msra.mxu3 %v2989_v45 }
 0x22c   :  { %1742 = vmatpush.msrb.mxu1 %v2939_v28  ;;  %1687 = vmatpush.msrb.mxu0 %v3006_v50 }
 0x22d   :  { %1586 = vmatpush.msra.mxu2 %v2973_v40  ;;  %1640 = vmatpush.msra.mxu3 %v3008_v51 }
 0x22e   :  { %1744 = vmatpush.msrb.mxu1 %v2959_v35  ;;  %1691 = vmatpush.msrb.mxu0 %v3025_v56 }
 0x22f   :  { %1589 = vmatpush.msra.mxu2 %v2992_v46  ;;  %1642 = vmatpush.msra.mxu3 %v3027_v57 }
 0x230   :  { %1746 = vmatpush.msrb.mxu1 %v2989_v45  ;;  %1695 = vmatpush.msrb.mxu0 %v3044_v62 }
 0x231   :  { %1592 = vmatpush.msra.mxu2 %v3011_v52  ;;  %1644 = vmatpush.msra.mxu3 %v3046_v63 }
 0x232   :  { %1748 = vmatpush.msrb.mxu1 %v3008_v51  ;;  %1699 = vmatpush.msrb.mxu0 %v3063_v7 }
 0x233   :  { %1595 = vmatpush.msra.mxu2 %v3030_v58  ;;  %1646 = vmatpush.msra.mxu3 %v3065_v8 }
 0x234   :  { %1750 = vmatpush.msrb.mxu1 %v3027_v57  ;;  %1703 = vmatpush.msrb.mxu0 %v3081_v30 }
 0x235   :  { %1598 = vmatpush.msra.mxu2 %v3978_v0  ;;  %1648 = vmatpush.msra.mxu3 %v3070_v13 }
 0x236   :  { %1752 = vmatpush.msrb.mxu1 %v3046_v63  ;;  %1707 = vmatpush.msrb.mxu0 %v3095_v39 }
 0x237   :  { %1601 = vmatpush.msra.mxu2 %v3979_v31  ;;  %1814 = vmatpush.msrb.mxu3 %v2965_v37 }
 0x238   :  { %1754 = vmatpush.msrb.mxu1 %v3065_v8  ;;  %1711 = vmatpush.msrb.mxu0 %v3109_v48 }
 0x239   :  { %1604 = vmatpush.msra.mxu2 %v3980_v47  ;;  %1820 = vmatpush.msrb.mxu3 %v2968_v38 }
 0x23a   :  { %1756 = vmatpush.msrb.mxu1 %v3070_v13  ;;  %1715 = vmatpush.msrb.mxu0 %v3123_v61 }
 0x23b   :  { %1607 = vmatpush.msra.mxu2 %v3098_v42  ;;  %1826 = vmatpush.msrb.mxu3 %v2985_v43 }
 0x23c   :  { %1719 = vmatpush.msrb.mxu0 %v3981_v12 }
 0x23d   :  { %1610 = vmatpush.msra.mxu2 %v4009_v18  ;;  %1832 = vmatpush.msrb.mxu3 %v4010_v53 }
 0x23f   :  { %1769 = vmatpush.msrb.mxu2 %v2868_v3  ;;  %1838 = vmatpush.msrb.mxu3 %v4011_v36 }
 0x241   :  { %1771 = vmatpush.msrb.mxu2 %v2870_v4  ;;  %1844 = vmatpush.msrb.mxu3 %v4012_v49 }
 0x243   :  { %1773 = vmatpush.msrb.mxu2 %v2872_v5  ;;  %1850 = vmatpush.msrb.mxu3 %v4013_v55 }
 0x245   :  { %1775 = vmatpush.msrb.mxu2 %v2883_v9  ;;  %1856 = vmatpush.msrb.mxu3 %v4014_v32 }
 0x247   :  { %1777 = vmatpush.msrb.mxu2 %v2885_v10  ;;  %1862 = vmatpush.msrb.mxu3 %v4015_v26 }
 0x249   :  { %1779 = vmatpush.msrb.mxu2 %v2887_v11  ;;  %1868 = vmatpush.msrb.mxu3 %v4016_v54 }
 0x24b   :  { %1781 = vmatpush.msrb.mxu2 %v2905_v17  ;;  %1874 = vmatpush.msrb.mxu3 %v4017_v6 }
 0x24d   :  { %1783 = vmatpush.msrb.mxu2 %v2930_v25  ;;  %1880 = vmatpush.msrb.mxu3 %v4018_v2 }
 0x24f   :  { %1785 = vmatpush.msrb.mxu2 %v2939_v28  ;;  %1886 = vmatpush.msrb.mxu3 %v4019_v59 }
 0x251   :  { %1787 = vmatpush.msrb.mxu2 %v2959_v35  ;;  %1892 = vmatpush.msrb.mxu3 %v4020_v60 }
 0x253   :  { %1789 = vmatpush.msrb.mxu2 %v2989_v45  ;;  %1898 = vmatpush.msrb.mxu3 %v4021_v1 }
 0x255   :  { %1791 = vmatpush.msrb.mxu2 %v3008_v51  ;;  %1904 = vmatpush.msrb.mxu3 %v4022_v44  ;;  %v2816_v44 = vld [vmem:[%s3922_s0 + $0x18] sm:$0xff] }
 0x257   :  { %1793 = vmatpush.msrb.mxu2 %v3027_v57 }
 0x259   :  { %1795 = vmatpush.msrb.mxu2 %v3046_v63 }
 0x25b   :  { %1797 = vmatpush.msrb.mxu2 %v3065_v8 }
 0x25d   :  { %1799 = vmatpush.msrb.mxu2 %v3070_v13 }
 0x295   :  { %v1267_v60 = vpop.f32.mrf.mxu0 }
 0x297   :  { %v1306_v26 = vpop.f32.mrf.mxu1 }
 0x299   :  { %v1213_v59 = vpop.f32.mrf.mxu3 }
 0x2a1   :  { %v1112_v2 = vpop.f32.mrf.mxu2  ;;  %v1412_v49 = vpop.f32.mrf.mxu3 }
 0x2a2   :  { %v1214_v6 = vadd.f32 %v1213_v59, %v1112_v2  ;;  %v4028_v59 = vld [vmem:[#allocation9_spill] sm:$0xff] }
 0x2a4   :  { %v1268_v54 = vadd.f32 %v1267_v60, %v1214_v6  ;;  %v4029_v60 = vld [vmem:[#allocation11_spill] sm:$0xff] }
 0x2a6   :  { %v1307_v32 = vadd.f32 %v1306_v26, %v1268_v54  ;;  %v4026_v26 = vld [vmem:[#allocation5_spill] sm:$0xff]  ;;  %v4027_v54 = vld [vmem:[#allocation7_spill] sm:$0xff] }
 0x2a9   :  { %v1375_v1 = vpop.f32.mrf.mxu2 }
 0x2aa   :  { %v1376_v55 = vadd.f32 %v1375_v1, %v1307_v32  ;;  %v4030_v1 = vld [vmem:[#allocation12_spill] sm:$0xff] }
 0x2ac   :  { %v1413_v36 = vadd.f32 %v1412_v49, %v1376_v55  ;;  %v4025_v55 = vld [vmem:[#allocation4_spill] sm:$0xff] }
 0x2ae   :  { %v1415_v53 = vadd.f32 %v2816_v44, %v1413_v36  ;;  %v4024_v36 = vld [vmem:[#allocation3_spill] sm:$0xff]  ;;  %v4031_v44 = vld [vmem:[#allocation14_spill] sm:$0xff] }
 0x2b0   :  { %2833 = vtanh.f32 %v1415_v53 }
 0x2b6   :  { %v2834_v18 = vpop.eup %2833 }
 0x2b7   :  { %2817 = vst [vmem:[%s3923_s2 + $0x18] sm:$0xff] %v2834_v18  ;;  %v1453_v2 = vand.u32 4294901760, %v2834_v18 }
 0x2b9   :  { %1559 = vmatmul.f32.vlgmr.msra.gmra.mxu1 %v1453_v2  ;;  %v1454_v6 = vsub.f32 %v2834_v18, %v1453_v2  ;;  %v4023_v18 = vld [vmem:[#allocation13_spill] sm:$0xff] }
 0x2ba   :  { %1965 = vmatpush.msra.mxu1 %v2868_v3 }
 0x2bb   :  { %1613 = vmatmul.f32.vlgmr.msra.gmra.mxu2 %v1454_v6  ;;  %v1455_v32 = vand.u32 4294901760, %v1454_v6 }
 0x2bc   :  { %1967 = vmatpush.msra.mxu1 %v2870_v4  ;;  %2006 = vmatpush.msra.mxu2 %v2922_v22 }
 0x2bd   :  { %1652 = vmatmul.f32.vlgmr.msra.gmra.mxu3 %v1455_v32  ;;  %v1456_v49 = vsub.f32 %v1454_v6, %v1455_v32  ;;  %v4033_v6 = vld [vmem:[#allocation17_spill] sm:$0xff]  ;;  %v4034_v32 = vld [vmem:[#allocation18_spill] sm:$0xff] }
 0x2be   :  { %1969 = vmatpush.msra.mxu1 %v2872_v5  ;;  %2073 = vmatpush.msra.mxu3 %v2868_v3 }
 0x2bf   :  { %v1457_v53 = vand.u32 4294901760, %v1456_v49  ;;  %2010 = vmatpush.msra.mxu2 %v2925_v23  ;;  %v4035_v49 = vld [vmem:[#allocation19_spill] sm:$0xff] }
 0x2c0   :  { %1971 = vmatpush.msra.mxu1 %v2883_v9  ;;  %2075 = vmatpush.msra.mxu3 %v2870_v4 }
 0x2c1   :  { %1458 = vmatmul.f32.vlgmr.msra.gmra.mxu0 %v1457_v53  ;;  %1758 = vmatmul.f32.vlgmr.msrb.gmra.mxu1 %v1453_v2  ;;  %v4036_v53 = vld [vmem:[#allocation20_spill] sm:$0xff] }
 0x2c2   :  { %1912 = vmatpush.msra.mxu0 %v2897_v14  ;;  %1973 = vmatpush.msra.mxu1 %v2885_v10 }
 0x2c3   :  { %2077 = vmatpush.msra.mxu3 %v2872_v5  ;;  %2014 = vmatpush.msra.mxu2 %v2928_v24 }
 0x2c4   :  { %1915 = vmatpush.msra.mxu0 %v2900_v15  ;;  %1975 = vmatpush.msra.mxu1 %v2887_v11 }
 0x2c5   :  { %2079 = vmatpush.msra.mxu3 %v2883_v9  ;;  %2018 = vmatpush.msra.mxu2 %v2937_v27 }
 0x2c6   :  { %1918 = vmatpush.msra.mxu0 %v2903_v16  ;;  %1977 = vmatpush.msra.mxu1 %v2905_v17 }
 0x2c7   :  { %2081 = vmatpush.msra.mxu3 %v2885_v10  ;;  %2022 = vmatpush.msra.mxu2 %v2953_v33 }
 0x2c8   :  { %1921 = vmatpush.msra.mxu0 %v2912_v19  ;;  %1979 = vmatpush.msra.mxu1 %v2930_v25 }
 0x2c9   :  { %1721 = vmatmul.f32.vlgmr.msrb.gmra.mxu0 %v1453_v2  ;;  %2083 = vmatpush.msra.mxu3 %v2887_v11  ;;  %v4032_v2 = vld [vmem:[#allocation15_spill] sm:$0xff] }
 0x2ca   :  { %1924 = vmatpush.msra.mxu0 %v2915_v20  ;;  %1981 = vmatpush.msra.mxu1 %v2939_v28 }
 0x2cb   :  { %2085 = vmatpush.msra.mxu3 %v2905_v17  ;;  %2026 = vmatpush.msra.mxu2 %v2957_v34 }
 0x2cc   :  { %1927 = vmatpush.msra.mxu0 %v2918_v21  ;;  %1983 = vmatpush.msra.mxu1 %v2959_v35 }
 0x2cd   :  { %2087 = vmatpush.msra.mxu3 %v2930_v25  ;;  %2030 = vmatpush.msra.mxu2 %v2977_v41 }
 0x2ce   :  { %1930 = vmatpush.msra.mxu0 %v2942_v29  ;;  %1985 = vmatpush.msra.mxu1 %v2989_v45 }
 0x2cf   :  { %2089 = vmatpush.msra.mxu3 %v2939_v28  ;;  %2034 = vmatpush.msra.mxu2 %v3006_v50 }
 0x2d0   :  { %1933 = vmatpush.msra.mxu0 %v2973_v40  ;;  %1987 = vmatpush.msra.mxu1 %v3008_v51 }
 0x2d1   :  { %2091 = vmatpush.msra.mxu3 %v2959_v35  ;;  %2038 = vmatpush.msra.mxu2 %v3025_v56 }
 0x2d2   :  { %1936 = vmatpush.msra.mxu0 %v2992_v46  ;;  %1989 = vmatpush.msra.mxu1 %v3027_v57 }
 0x2d3   :  { %2093 = vmatpush.msra.mxu3 %v2989_v45  ;;  %2042 = vmatpush.msra.mxu2 %v3044_v62 }
 0x2d4   :  { %1939 = vmatpush.msra.mxu0 %v3011_v52  ;;  %1991 = vmatpush.msra.mxu1 %v3046_v63 }
 0x2d5   :  { %2095 = vmatpush.msra.mxu3 %v3008_v51  ;;  %2046 = vmatpush.msra.mxu2 %v3063_v7 }
 0x2d6   :  { %1942 = vmatpush.msra.mxu0 %v3030_v58  ;;  %1993 = vmatpush.msra.mxu1 %v3065_v8 }
 0x2d7   :  { %2097 = vmatpush.msra.mxu3 %v3027_v57  ;;  %2050 = vmatpush.msra.mxu2 %v3081_v30 }
 0x2d8   :  { %1945 = vmatpush.msra.mxu0 %v3978_v0  ;;  %1995 = vmatpush.msra.mxu1 %v3070_v13 }
 0x2d9   :  { %2099 = vmatpush.msra.mxu3 %v3046_v63  ;;  %2054 = vmatpush.msra.mxu2 %v3095_v39 }
 0x2da   :  { %1948 = vmatpush.msra.mxu0 %v3979_v31  ;;  %2161 = vmatpush.msrb.mxu1 %v2965_v37 }
 0x2db   :  { %2101 = vmatpush.msra.mxu3 %v3065_v8  ;;  %2058 = vmatpush.msra.mxu2 %v3109_v48 }
 0x2dc   :  { %1951 = vmatpush.msra.mxu0 %v3980_v47  ;;  %2167 = vmatpush.msrb.mxu1 %v2968_v38 }
 0x2dd   :  { %2103 = vmatpush.msra.mxu3 %v3070_v13  ;;  %2062 = vmatpush.msra.mxu2 %v3123_v61 }
 0x2de   :  { %1954 = vmatpush.msra.mxu0 %v3098_v42  ;;  %2173 = vmatpush.msrb.mxu1 %v2985_v43 }
 0x2df   :  { %2066 = vmatpush.msra.mxu2 %v3981_v12 }
 0x2e0   :  { %1957 = vmatpush.msra.mxu0 %v4023_v18  ;;  %2179 = vmatpush.msrb.mxu1 %v4024_v36 }
 0x2e2   :  { %2116 = vmatpush.msrb.mxu0 %v2868_v3  ;;  %2185 = vmatpush.msrb.mxu1 %v4025_v55 }
 0x2e4   :  { %2118 = vmatpush.msrb.mxu0 %v2870_v4  ;;  %2191 = vmatpush.msrb.mxu1 %v4026_v26 }
 0x2e6   :  { %2120 = vmatpush.msrb.mxu0 %v2872_v5  ;;  %2197 = vmatpush.msrb.mxu1 %v4027_v54 }
 0x2e8   :  { %2122 = vmatpush.msrb.mxu0 %v2883_v9  ;;  %2203 = vmatpush.msrb.mxu1 %v4028_v59 }
 0x2ea   :  { %2124 = vmatpush.msrb.mxu0 %v2885_v10  ;;  %2209 = vmatpush.msrb.mxu1 %v4029_v60 }
 0x2ec   :  { %2126 = vmatpush.msrb.mxu0 %v2887_v11  ;;  %2215 = vmatpush.msrb.mxu1 %v4030_v1 }
 0x2ee   :  { %2128 = vmatpush.msrb.mxu0 %v2905_v17  ;;  %2221 = vmatpush.msrb.mxu1 %v4031_v44 }
 0x2f0   :  { %2130 = vmatpush.msrb.mxu0 %v2930_v25  ;;  %2227 = vmatpush.msrb.mxu1 %v4032_v2 }
 0x2f2   :  { %2132 = vmatpush.msrb.mxu0 %v2939_v28  ;;  %2233 = vmatpush.msrb.mxu1 %v4033_v6 }
 0x2f4   :  { %2134 = vmatpush.msrb.mxu0 %v2959_v35  ;;  %2239 = vmatpush.msrb.mxu1 %v4034_v32 }
 0x2f6   :  { %2136 = vmatpush.msrb.mxu0 %v2989_v45  ;;  %2245 = vmatpush.msrb.mxu1 %v4035_v49 }
 0x2f8   :  { %2138 = vmatpush.msrb.mxu0 %v3008_v51  ;;  %2251 = vmatpush.msrb.mxu1 %v4036_v53  ;;  %v2818_v53 = vld [vmem:[%s3922_s0 + $0x20] sm:$0xff] }
 0x2fa   :  { %2140 = vmatpush.msrb.mxu0 %v3027_v57 }
 0x2fc   :  { %2142 = vmatpush.msrb.mxu0 %v3046_v63 }
 0x2fe   :  { %2144 = vmatpush.msrb.mxu0 %v3065_v8 }
 0x300   :  { %2146 = vmatpush.msrb.mxu0 %v3070_v13 }
 0x336   :  { %v1560_v6 = vpop.f32.mrf.mxu1 }
 0x33e   :  { %v1459_v2 = vpop.f32.mrf.mxu0  ;;  %v1614_v32 = vpop.f32.mrf.mxu2 }
 0x33f   :  { %v1561_v44 = vadd.f32 %v1560_v6, %v1459_v2  ;;  %v1759_v26 = vpop.f32.mrf.mxu1  ;;  %v4045_v6 = vld [vmem:[#allocation14_spill] sm:$0xff] }
 0x340   :  { %v1653_v60 = vpop.f32.mrf.mxu3 }
 0x341   :  { %v1615_v1 = vadd.f32 %v1614_v32, %v1561_v44  ;;  %v4046_v32 = vld [vmem:[#allocation15_spill] sm:$0xff] }
 0x343   :  { %v1654_v59 = vadd.f32 %v1653_v60, %v1615_v1  ;;  %v4043_v60 = vld [vmem:[#allocation11_spill] sm:$0xff]  ;;  %v4044_v1 = vld [vmem:[#allocation12_spill] sm:$0xff] }
 0x346   :  { %v1722_v49 = vpop.f32.mrf.mxu0 }
 0x347   :  { %v1723_v54 = vadd.f32 %v1722_v49, %v1654_v59  ;;  %v4047_v49 = vld [vmem:[#allocation17_spill] sm:$0xff] }
 0x349   :  { %v1760_v55 = vadd.f32 %v1759_v26, %v1723_v54  ;;  %v4041_v54 = vld [vmem:[#allocation7_spill] sm:$0xff] }
 0x34b   :  { %v1762_v36 = vadd.f32 %v2818_v53, %v1760_v55  ;;  %v4039_v55 = vld [vmem:[#allocation4_spill] sm:$0xff]  ;;  %v4048_v53 = vld [vmem:[#allocation18_spill] sm:$0xff] }
 0x34d   :  { %2835 = vtanh.f32 %v1762_v36 }
 0x353   :  { %v2836_v18 = vpop.eup %2835 }
 0x354   :  { %2819 = vst [vmem:[%s3923_s2 + $0x20] sm:$0xff] %v2836_v18  ;;  %v1800_v2 = vand.u32 4294901760, %v2836_v18 }
 0x356   :  { %1906 = vmatmul.f32.vlgmr.msrb.gmra.mxu3 %v1800_v2  ;;  %v1801_v44 = vsub.f32 %v2836_v18, %v1800_v2  ;;  %v4037_v18 = vld [vmem:[#allocation13_spill] sm:$0xff] }
 0x357   :  { %2312 = vmatpush.msrb.mxu3 %v2868_v3 }
 0x358   :  { %1960 = vmatmul.f32.vlgmr.msra.gmra.mxu0 %v1801_v44  ;;  %v1802_v59 = vand.u32 4294901760, %v1801_v44 }
 0x359   :  { %2314 = vmatpush.msrb.mxu3 %v2870_v4  ;;  %2353 = vmatpush.msra.mxu0 %v2922_v22 }
 0x35a   :  { %1999 = vmatmul.f32.vlgmr.msra.gmra.mxu1 %v1802_v59  ;;  %v1803_v26 = vsub.f32 %v1801_v44, %v1802_v59  ;;  %v4050_v44 = vld [vmem:[#allocation20_spill] sm:$0xff] }
 0x35b   :  { %2316 = vmatpush.msrb.mxu3 %v2872_v5  ;;  %2420 = vmatpush.msra.mxu1 %v2868_v3 }
 0x35c   :  { %v1804_v36 = vand.u32 4294901760, %v1803_v26  ;;  %2357 = vmatpush.msra.mxu0 %v2925_v23 }
 0x35d   :  { %2318 = vmatpush.msrb.mxu3 %v2883_v9  ;;  %2422 = vmatpush.msra.mxu1 %v2870_v4 }
 0x35e   :  { %1805 = vmatmul.f32.vlgmr.msrb.gmra.mxu2 %v1804_v36  ;;  %2105 = vmatmul.f32.vlgmr.msra.gmra.mxu3 %v1800_v2 }
 0x35f   :  { %2259 = vmatpush.msrb.mxu2 %v2897_v14  ;;  %2320 = vmatpush.msrb.mxu3 %v2885_v10 }
 0x360   :  { %2424 = vmatpush.msra.mxu1 %v2872_v5  ;;  %2361 = vmatpush.msra.mxu0 %v2928_v24 }
 0x361   :  { %2262 = vmatpush.msrb.mxu2 %v2900_v15  ;;  %2322 = vmatpush.msrb.mxu3 %v2887_v11 }
 0x362   :  { %2426 = vmatpush.msra.mxu1 %v2883_v9  ;;  %2365 = vmatpush.msra.mxu0 %v2937_v27 }
 0x363   :  { %2265 = vmatpush.msrb.mxu2 %v2903_v16  ;;  %2324 = vmatpush.msrb.mxu3 %v2905_v17 }
 0x364   :  { %2428 = vmatpush.msra.mxu1 %v2885_v10  ;;  %2369 = vmatpush.msra.mxu0 %v2953_v33 }
 0x365   :  { %2268 = vmatpush.msrb.mxu2 %v2912_v19  ;;  %2326 = vmatpush.msrb.mxu3 %v2930_v25 }
 0x366   :  { %2068 = vmatmul.f32.vlgmr.msra.gmra.mxu2 %v1800_v2  ;;  %2430 = vmatpush.msra.mxu1 %v2887_v11  ;;  %v4049_v2 = vld [vmem:[#allocation19_spill] sm:$0xff] }
 0x367   :  { %2271 = vmatpush.msrb.mxu2 %v2915_v20  ;;  %2328 = vmatpush.msrb.mxu3 %v2939_v28 }
 0x368   :  { %2432 = vmatpush.msra.mxu1 %v2905_v17  ;;  %2373 = vmatpush.msra.mxu0 %v2957_v34 }
 0x369   :  { %2274 = vmatpush.msrb.mxu2 %v2918_v21  ;;  %2330 = vmatpush.msrb.mxu3 %v2959_v35 }
 0x36a   :  { %2434 = vmatpush.msra.mxu1 %v2930_v25  ;;  %2377 = vmatpush.msra.mxu0 %v2977_v41 }
 0x36b   :  { %2277 = vmatpush.msrb.mxu2 %v2942_v29  ;;  %2332 = vmatpush.msrb.mxu3 %v2989_v45 }
 0x36c   :  { %2436 = vmatpush.msra.mxu1 %v2939_v28  ;;  %2381 = vmatpush.msra.mxu0 %v3006_v50 }
 0x36d   :  { %2280 = vmatpush.msrb.mxu2 %v2973_v40  ;;  %2334 = vmatpush.msrb.mxu3 %v3008_v51 }
 0x36e   :  { %2438 = vmatpush.msra.mxu1 %v2959_v35  ;;  %2385 = vmatpush.msra.mxu0 %v3025_v56 }
 0x36f   :  { %2283 = vmatpush.msrb.mxu2 %v2992_v46  ;;  %2336 = vmatpush.msrb.mxu3 %v3027_v57 }
 0x370   :  { %2440 = vmatpush.msra.mxu1 %v2989_v45  ;;  %2389 = vmatpush.msra.mxu0 %v3044_v62 }
 0x371   :  { %2286 = vmatpush.msrb.mxu2 %v3011_v52  ;;  %2338 = vmatpush.msrb.mxu3 %v3046_v63 }
 0x372   :  { %2442 = vmatpush.msra.mxu1 %v3008_v51  ;;  %2393 = vmatpush.msra.mxu0 %v3063_v7 }
 0x373   :  { %2289 = vmatpush.msrb.mxu2 %v3030_v58  ;;  %2340 = vmatpush.msrb.mxu3 %v3065_v8 }
 0x374   :  { %2444 = vmatpush.msra.mxu1 %v3027_v57  ;;  %2397 = vmatpush.msra.mxu0 %v3081_v30 }
 0x375   :  { %2292 = vmatpush.msrb.mxu2 %v3978_v0  ;;  %2342 = vmatpush.msrb.mxu3 %v3070_v13 }
 0x376   :  { %2446 = vmatpush.msra.mxu1 %v3046_v63  ;;  %2401 = vmatpush.msra.mxu0 %v3095_v39 }
 0x377   :  { %2295 = vmatpush.msrb.mxu2 %v3979_v31  ;;  %2508 = vmatpush.msra.mxu3 %v2965_v37  ;;  %v4038_v37 = vld [vmem:[#allocation3_spill] sm:$0xff] }
 0x378   :  { %2448 = vmatpush.msra.mxu1 %v3065_v8  ;;  %2405 = vmatpush.msra.mxu0 %v3109_v48 }
 0x379   :  { %2298 = vmatpush.msrb.mxu2 %v3980_v47  ;;  %2514 = vmatpush.msra.mxu3 %v2968_v38  ;;  %v4040_v38 = vld [vmem:[#allocation5_spill] sm:$0xff] }
 0x37a   :  { %2450 = vmatpush.msra.mxu1 %v3070_v13  ;;  %2409 = vmatpush.msra.mxu0 %v3123_v61 }
 0x37b   :  { %2301 = vmatpush.msrb.mxu2 %v3098_v42  ;;  %2520 = vmatpush.msra.mxu3 %v2985_v43  ;;  %v4042_v43 = vld [vmem:[#allocation9_spill] sm:$0xff] }
 0x37c   :  { %2413 = vmatpush.msra.mxu0 %v3981_v12 }
 0x37d   :  { %2304 = vmatpush.msrb.mxu2 %v4037_v18  ;;  %2526 = vmatpush.msra.mxu3 %v4038_v37 }
 0x37f   :  { %2463 = vmatpush.msra.mxu2 %v2868_v3  ;;  %2532 = vmatpush.msra.mxu3 %v4039_v55 }
 0x381   :  { %2465 = vmatpush.msra.mxu2 %v2870_v4  ;;  %2538 = vmatpush.msra.mxu3 %v4040_v38 }
 0x383   :  { %2467 = vmatpush.msra.mxu2 %v2872_v5  ;;  %2544 = vmatpush.msra.mxu3 %v4041_v54 }
 0x385   :  { %2469 = vmatpush.msra.mxu2 %v2883_v9  ;;  %2550 = vmatpush.msra.mxu3 %v4042_v43 }
 0x387   :  { %2471 = vmatpush.msra.mxu2 %v2885_v10  ;;  %2556 = vmatpush.msra.mxu3 %v4043_v60 }
 0x389   :  { %2473 = vmatpush.msra.mxu2 %v2887_v11  ;;  %2562 = vmatpush.msra.mxu3 %v4044_v1 }
 0x38b   :  { %2475 = vmatpush.msra.mxu2 %v2905_v17  ;;  %2568 = vmatpush.msra.mxu3 %v4045_v6  ;;  %v2820_v6 = vld [vmem:[%s3922_s0 + $0x28] sm:$0xff] }
 0x38d   :  { %2477 = vmatpush.msra.mxu2 %v2930_v25  ;;  %2574 = vmatpush.msra.mxu3 %v4046_v32 }
 0x38f   :  { %2479 = vmatpush.msra.mxu2 %v2939_v28  ;;  %2580 = vmatpush.msra.mxu3 %v4047_v49 }
 0x391   :  { %2481 = vmatpush.msra.mxu2 %v2959_v35  ;;  %2586 = vmatpush.msra.mxu3 %v4048_v53 }
 0x393   :  { %2483 = vmatpush.msra.mxu2 %v2989_v45  ;;  %2592 = vmatpush.msra.mxu3 %v4049_v2 }
 0x395   :  { %2485 = vmatpush.msra.mxu2 %v3008_v51  ;;  %2598 = vmatpush.msra.mxu3 %v4050_v44 }
 0x397   :  { %2487 = vmatpush.msra.mxu2 %v3027_v57 }
 0x399   :  { %2489 = vmatpush.msra.mxu2 %v3046_v63 }
 0x39b   :  { %2491 = vmatpush.msra.mxu2 %v3065_v8 }
 0x39d   :  { %2493 = vmatpush.msra.mxu2 %v3070_v13 }
 0x3d5   :  { %v1961_v37 = vpop.f32.mrf.mxu0 }
 0x3d7   :  { %v2000_v38 = vpop.f32.mrf.mxu1 }
 0x3d9   :  { %v1907_v59 = vpop.f32.mrf.mxu3 }
 0x3e1   :  { %v1806_v26 = vpop.f32.mrf.mxu2  ;;  %v2106_v1 = vpop.f32.mrf.mxu3 }
 0x3e2   :  { %v1908_v36 = vadd.f32 %v1907_v59, %v1806_v26 }
 0x3e4   :  { %v1962_v55 = vadd.f32 %v1961_v37, %v1908_v36 }
 0x3e6   :  { %v2001_v54 = vadd.f32 %v2000_v38, %v1962_v55 }
 0x3e9   :  { %v2069_v43 = vpop.f32.mrf.mxu2 }
 0x3ea   :  { %v2070_v60 = vadd.f32 %v2069_v43, %v2001_v54 }
 0x3ec   :  { %v2107_v32 = vadd.f32 %v2106_v1, %v2070_v60 }
 0x3ee   :  { %v2109_v49 = vadd.f32 %v2820_v6, %v2107_v32 }
 0x3f0   :  { %2837 = vtanh.f32 %v2109_v49 }
 0x3f6   :  { %v2838_v53 = vpop.eup %2837 }
 0x3f7   :  { %2821 = vst [vmem:[%s3923_s2 + $0x28] sm:$0xff] %v2838_v53  ;;  %v2147_v2 = vand.u32 4294901760, %v2838_v53 }
 0x3f9   :  { %2253 = vmatmul.f32.vlgmr.msrb.gmra.mxu1 %v2147_v2  ;;  %v2148_v44 = vsub.f32 %v2838_v53, %v2147_v2 }
 0x3fa   :  { %2659 = vmatpush.msrb.mxu1 %v2868_v3 }
 0x3fb   :  { %2307 = vmatmul.f32.vlgmr.msrb.gmra.mxu2 %v2148_v44  ;;  %v2149_v59 = vand.u32 4294901760, %v2148_v44 }
 0x3fc   :  { %2661 = vmatpush.msrb.mxu1 %v2870_v4  ;;  %2700 = vmatpush.msrb.mxu2 %v2922_v22 }
 0x3fd   :  { %2346 = vmatmul.f32.vlgmr.msrb.gmra.mxu3 %v2149_v59  ;;  %v2150_v26 = vsub.f32 %v2148_v44, %v2149_v59 }
 0x3fe   :  { %2663 = vmatpush.msrb.mxu1 %v2872_v5  ;;  %2767 = vmatpush.msrb.mxu3 %v2868_v3 }
 0x3ff   :  { %v2151_v36 = vand.u32 4294901760, %v2150_v26  ;;  %2704 = vmatpush.msrb.mxu2 %v2925_v23 }
 0x400   :  { %2665 = vmatpush.msrb.mxu1 %v2883_v9  ;;  %2769 = vmatpush.msrb.mxu3 %v2870_v4 }
 0x401   :  { %2152 = vmatmul.f32.vlgmr.msrb.gmra.mxu0 %v2151_v36  ;;  %2452 = vmatmul.f32.vlgmr.msra.gmra.mxu1 %v2147_v2 }
 0x402   :  { %2606 = vmatpush.msrb.mxu0 %v2897_v14  ;;  %2667 = vmatpush.msrb.mxu1 %v2885_v10 }
 0x403   :  { %2771 = vmatpush.msrb.mxu3 %v2872_v5  ;;  %2708 = vmatpush.msrb.mxu2 %v2928_v24 }
 0x404   :  { %2609 = vmatpush.msrb.mxu0 %v2900_v15  ;;  %2669 = vmatpush.msrb.mxu1 %v2887_v11 }
 0x405   :  { %2773 = vmatpush.msrb.mxu3 %v2883_v9  ;;  %2712 = vmatpush.msrb.mxu2 %v2937_v27 }
 0x406   :  { %2612 = vmatpush.msrb.mxu0 %v2903_v16  ;;  %2671 = vmatpush.msrb.mxu1 %v2905_v17 }
 0x407   :  { %2775 = vmatpush.msrb.mxu3 %v2885_v10  ;;  %2716 = vmatpush.msrb.mxu2 %v2953_v33 }
 0x408   :  { %2615 = vmatpush.msrb.mxu0 %v2912_v19  ;;  %2673 = vmatpush.msrb.mxu1 %v2930_v25  ;;  %v2822_v19 = vld [vmem:[%s3922_s0 + $0x30] sm:$0xff] }
 0x409   :  { %2415 = vmatmul.f32.vlgmr.msra.gmra.mxu0 %v2147_v2  ;;  %2777 = vmatpush.msrb.mxu3 %v2887_v11 }
 0x40a   :  { %2618 = vmatpush.msrb.mxu0 %v2915_v20  ;;  %2675 = vmatpush.msrb.mxu1 %v2939_v28 }
 0x40b   :  { %2779 = vmatpush.msrb.mxu3 %v2905_v17  ;;  %2720 = vmatpush.msrb.mxu2 %v2957_v34 }
 0x40c   :  { %2621 = vmatpush.msrb.mxu0 %v2918_v21  ;;  %2677 = vmatpush.msrb.mxu1 %v2959_v35 }
 0x40d   :  { %2781 = vmatpush.msrb.mxu3 %v2930_v25  ;;  %2724 = vmatpush.msrb.mxu2 %v2977_v41 }
 0x40e   :  { %2624 = vmatpush.msrb.mxu0 %v2942_v29  ;;  %2679 = vmatpush.msrb.mxu1 %v2989_v45 }
 0x40f   :  { %2783 = vmatpush.msrb.mxu3 %v2939_v28  ;;  %2728 = vmatpush.msrb.mxu2 %v3006_v50 }
 0x410   :  { %2627 = vmatpush.msrb.mxu0 %v2973_v40  ;;  %2681 = vmatpush.msrb.mxu1 %v3008_v51 }
 0x411   :  { %2785 = vmatpush.msrb.mxu3 %v2959_v35  ;;  %2732 = vmatpush.msrb.mxu2 %v3025_v56 }
 0x412   :  { %2630 = vmatpush.msrb.mxu0 %v2992_v46  ;;  %2683 = vmatpush.msrb.mxu1 %v3027_v57 }
 0x413   :  { %2787 = vmatpush.msrb.mxu3 %v2989_v45  ;;  %2736 = vmatpush.msrb.mxu2 %v3044_v62 }
 0x414   :  { %2633 = vmatpush.msrb.mxu0 %v3011_v52  ;;  %2685 = vmatpush.msrb.mxu1 %v3046_v63  ;;  %v2824_v52 = vld [vmem:[%s3922_s0 + $0x38] sm:$0xff] }
 0x415   :  { %2789 = vmatpush.msrb.mxu3 %v3008_v51  ;;  %2740 = vmatpush.msrb.mxu2 %v3063_v7 }
 0x416   :  { %2636 = vmatpush.msrb.mxu0 %v3030_v58  ;;  %2687 = vmatpush.msrb.mxu1 %v3065_v8 }
 0x417   :  { %2791 = vmatpush.msrb.mxu3 %v3027_v57  ;;  %2744 = vmatpush.msrb.mxu2 %v3081_v30 }
 0x418   :  { %2639 = vmatpush.msrb.mxu0 %v3978_v0  ;;  %2689 = vmatpush.msrb.mxu1 %v3070_v13 }
 0x419   :  { %2793 = vmatpush.msrb.mxu3 %v3046_v63  ;;  %2748 = vmatpush.msrb.mxu2 %v3095_v39 }
 0x41a   :  { %2642 = vmatpush.msrb.mxu0 %v3979_v31 }
 0x41b   :  { %2795 = vmatpush.msrb.mxu3 %v3065_v8  ;;  %2752 = vmatpush.msrb.mxu2 %v3109_v48 }
 0x41c   :  { %2645 = vmatpush.msrb.mxu0 %v3980_v47 }
 0x41d   :  { %2797 = vmatpush.msrb.mxu3 %v3070_v13  ;;  %2756 = vmatpush.msrb.mxu2 %v3123_v61 }
 0x41e   :  { %2648 = vmatpush.msrb.mxu0 %v3098_v42 }
 0x41f   :  { %2760 = vmatpush.msrb.mxu2 %v3981_v12 }
 0x420   :  { %2651 = vmatpush.msrb.mxu0 %v4037_v18 }
 0x476   :  { %v2254_v3 = vpop.f32.mrf.mxu1 }
 0x47e   :  { %v2153_v4 = vpop.f32.mrf.mxu0  ;;  %v2308_v9 = vpop.f32.mrf.mxu2 }
 0x47f   :  { %v2255_v5 = vadd.f32 %v2254_v3, %v2153_v4  ;;  %v2453_v17 = vpop.f32.mrf.mxu1 }
 0x480   :  { %v2347_v11 = vpop.f32.mrf.mxu3 }
 0x481   :  { %v2309_v10 = vadd.f32 %v2308_v9, %v2255_v5 }
 0x483   :  { %v2348_v14 = vadd.f32 %v2347_v11, %v2309_v10 }
 0x486   :  { %v2416_v15 = vpop.f32.mrf.mxu0 }
 0x487   :  { %v2417_v16 = vadd.f32 %v2416_v15, %v2348_v14 }
 0x489   :  { %v2454_v20 = vadd.f32 %v2453_v17, %v2417_v16 }
 0x48b   :  { %v2456_v21 = vadd.f32 %v2822_v19, %v2454_v20 }
 0x48d   :  { %2839 = vtanh.f32 %v2456_v21 }
 0x493   :  { %v2840_v22 = vpop.eup %2839 }
 0x494   :  { %2823 = vst [vmem:[%s3923_s2 + $0x30] sm:$0xff] %v2840_v22  ;;  %v2494_v23 = vand.u32 4294901760, %v2840_v22 }
 0x496   :  { %2600 = vmatmul.f32.vlgmr.msra.gmra.mxu3 %v2494_v23  ;;  %v2495_v24 = vsub.f32 %v2840_v22, %v2494_v23 }
 0x498   :  { %2654 = vmatmul.f32.vlgmr.msrb.gmra.mxu0 %v2495_v24  ;;  %v2496_v25 = vand.u32 4294901760, %v2495_v24 }
 0x49a   :  { %2693 = vmatmul.f32.vlgmr.msrb.gmra.mxu1 %v2496_v25  ;;  %v2497_v27 = vsub.f32 %v2495_v24, %v2496_v25 }
 0x49c   :  { %v2498_v28 = vand.u32 4294901760, %v2497_v27 }
 0x49e   :  { %2499 = vmatmul.f32.vlgmr.msra.gmra.mxu2 %v2498_v28  ;;  %2799 = vmatmul.f32.vlgmr.msrb.gmra.mxu3 %v2494_v23 }
 0x4a6   :  { %2762 = vmatmul.f32.vlgmr.msrb.gmra.mxu2 %v2494_v23 }
 0x515   :  { %v2655_v35 = vpop.f32.mrf.mxu0 }
 0x517   :  { %v2694_v41 = vpop.f32.mrf.mxu1 }
 0x519   :  { %v2601_v29 = vpop.f32.mrf.mxu3 }
 0x521   :  { %v2500_v33 = vpop.f32.mrf.mxu2  ;;  %v2800_v51 = vpop.f32.mrf.mxu3 }
 0x522   :  { %v2602_v34 = vadd.f32 %v2601_v29, %v2500_v33 }
 0x524   :  { %v2656_v40 = vadd.f32 %v2655_v35, %v2602_v34 }
 0x526   :  { %v2695_v45 = vadd.f32 %v2694_v41, %v2656_v40 }
 0x529   :  { %v2763_v46 = vpop.f32.mrf.mxu2 }
 0x52a   :  { %v2764_v50 = vadd.f32 %v2763_v46, %v2695_v45 }
 0x52c   :  { %v2801_v56 = vadd.f32 %v2800_v51, %v2764_v50 }
 0x52e   :  { %v2803_v57 = vadd.f32 %v2824_v52, %v2801_v56 }
 0x530   :  { %2841 = vtanh.f32 %v2803_v57 }
 0x536   :  { %v2842_v58 = vpop.eup %2841 }
 0x537   :  { %2825 = vst [vmem:[%s3923_s2 + $0x38] sm:$0xff] %v2842_v58 }

</bundles_post_ra>
